<compile_context>
chip_gen: v7x
topology: tpu7x:2x2x1
jax: 0.10.0
libtpu: 0.0.40
codegen_flags: <defaults>
</compile_context>

<pallas_src>
import jax
import jax.numpy as jnp
from jax.experimental import pallas as pl
from jax.experimental.pallas import tpu as pltpu

CONV_OUT = 32
CONV_K = 3
POOL_K = 2
HIDDEN = 512

MAX_TILE_B = 1024   # per-tile batch rows for large B
MIN_SPLIT_B = 32    # below this, a single grid step (block == full array)

_F32_MAX = float(jnp.finfo(jnp.float32).max)


def _round_up(x, m):
    return (x + m - 1) // m * m


def _relu_nan_to_num(x):
    # == relu(nan_to_num(x)) in 3 VPU ops: NaN / -Inf / negatives -> 0,
    # +Inf -> f32 max, finite positives unchanged.
    return jnp.minimum(jnp.where(x > 0, x, 0.0), _F32_MAX)


def _disc_kernel(hist_ref, state_ref, cwe_ref, cwo_ref, cb_ref,
                 w1_ref, b1_ref, w2_ref, b2_ref, w3_ref, b3_ref,
                 w4_ref, b4_ref, w5_ref, b5_ref, out_ref):
    hist = hist_ref[...]                               # (TB, L*C)  bf16

    # --- Conv1d: two block-Toeplitz matmuls (even / odd conv positions) ----
    conv_e = jnp.dot(hist, cwe_ref[...], preferred_element_type=jnp.float32)
    conv_o = jnp.dot(hist, cwo_ref[...], preferred_element_type=jnp.float32)

    # --- MaxPool1d(k=2,s=2) + fused bias/nan_to_num/relu epilogue ----------
    # fmax pools raw accumulators (NaN in one slot defers to the other), then
    # the monotone epilogue is applied once -> matches reference ordering.
    pooled = _relu_nan_to_num(jnp.fmax(conv_e, conv_o) + cb_ref[...])  # (TB, 32*P)

    # --- concat(state) + fc_input + 3 hidden layers (bf16 MXU, f32 acc) ----
    feats = jnp.concatenate([pooled, state_ref[...]], axis=-1)
    h = feats.astype(jnp.bfloat16)
    for w_ref, b_ref in ((w1_ref, b1_ref), (w2_ref, b2_ref),
                         (w3_ref, b3_ref), (w4_ref, b4_ref)):
        a = jnp.dot(h, w_ref[...], preferred_element_type=jnp.float32) + b_ref[...]
        h = _relu_nan_to_num(a).astype(jnp.bfloat16)   # bf16 between layers

    # --- fc_output (N=1): VPU multiply + lane reduction (MXU stays free) ---
    logits = jnp.sum(h * w5_ref[...], axis=-1, keepdims=True) + b5_ref[0]
    logits = jnp.nan_to_num(logits)                    # tiny (TB, 1) tensor
    sig = pl.reciprocal(1.0 + jnp.exp(-logits), approx=True)
    out_ref[...] = sig.astype(out_ref.dtype)


def init_params(key, state_features, action_features, history_length):
    """PyTorch-layout parameters (same init scheme as nn.Linear / nn.Conv1d)."""
    in_ch = state_features + action_features
    conv_l_out = history_length - CONV_K + 1
    pool_l_out = (conv_l_out - POOL_K) // POOL_K + 1
    fc_in = CONV_OUT * pool_l_out + state_features

    ks = jax.random.split(key, 6)

    def lin(k, out_f, in_f):
        kw, kb = jax.random.split(k)
        bound = 1.0 / jnp.sqrt(float(in_f))
        w = jax.random.uniform(kw, (out_f, in_f), jnp.float32, -bound, bound)
        b = jax.random.uniform(kb, (out_f,), jnp.float32, -bound, bound)
        return w, b

    kcw, kcb = jax.random.split(ks[0])
    cbound = 1.0 / jnp.sqrt(float(in_ch * CONV_K))
    return {
        "conv_w": jax.random.uniform(kcw, (CONV_OUT, in_ch, CONV_K),
                                     jnp.float32, -cbound, cbound),
        "conv_b": jax.random.uniform(kcb, (CONV_OUT,), jnp.float32,
                                     -cbound, cbound),
        "fc_input": lin(ks[1], HIDDEN, fc_in),
        "fc_m1": lin(ks[2], HIDDEN, HIDDEN),
        "fc_m2": lin(ks[3], HIDDEN, HIDDEN),
        "fc_m3": lin(ks[4], HIDDEN, HIDDEN),
        "fc_out": lin(ks[5], 1, HIDDEN),
    }


def prepare_kernel_params(params, history_length):
    """One-time weight re-layout (outside the per-call path)."""
    conv_w = params["conv_w"]                     # (OC, C, K)
    OC, C, K = conv_w.shape
    L = history_length
    l_out = L - K + 1
    P = (l_out - POOL_K) // POOL_K + 1

    # Block-Toeplitz conv weight: W[l, c, p, oc] = conv_w[oc, c, l-p] (valid k).
    wt = jnp.transpose(conv_w, (2, 1, 0))         # (K, C, OC)
    W = jnp.zeros((L, C, l_out, OC), jnp.float32)
    for p in range(l_out):
        for k in range(K):
            W = W.at[p + k, :, p, :].set(wt[k])

    def parity_cols(parity):
        sel = W[:, :, parity:2 * P:2, :]          # (L, C, P, OC)
        # column order oc*P + t  (== PyTorch flatten of the pooled (B, OC, P))
        return jnp.transpose(sel, (0, 1, 3, 2)).reshape(L * C, OC * P)

    def lin(p):
        w, b = p
        return w.T.astype(jnp.bfloat16), b[None, :].astype(jnp.float32)

    w1, b1 = lin(params["fc_input"])
    w2, b2 = lin(params["fc_m1"])
    w3, b3 = lin(params["fc_m2"])
    w4, b4 = lin(params["fc_m3"])

    return {
        "cwe": parity_cols(0).astype(jnp.bfloat16),            # (L*C, OC*P)
        "cwo": parity_cols(1).astype(jnp.bfloat16),             # (L*C, OC*P)
        "cb": jnp.repeat(params["conv_b"], P)[None, :].astype(jnp.float32),
        "w1": w1, "b1": b1, "w2": w2, "b2": b2,
        "w3": w3, "b3": b3, "w4": w4, "b4": b4,
        "w5": params["fc_out"][0].astype(jnp.float32),          # (1, H)
        "b5": params["fc_out"][1].astype(jnp.float32),          # (1,)
    }


def _batch_tiling(B):
    if B < MIN_SPLIT_B:
        return B, B, 1                                  # tile_b, b_pad, tiles
    num_tiles = max(2, pl.cdiv(B, MAX_TILE_B))          # >=2 -> both v7x TCs
    tile_b = _round_up(pl.cdiv(B, num_tiles), 16)       # <=16 rows waste/tile
    return tile_b, tile_b * num_tiles, num_tiles


@jax.jit
def discriminator_forward(kp, history, state):
    B, L, C = history.shape
    S = state.shape[1]
    tile_b, b_pad, num_tiles = _batch_tiling(B)

    # Layout plumbing only (no compute).
    hist2d = history.reshape(B, L * C).astype(jnp.bfloat16)
    state_f = state.astype(jnp.float32)
    if b_pad != B:
        hist2d = jnp.pad(hist2d, ((0, b_pad - B), (0, 0)))
        state_f = jnp.pad(state_f, ((0, b_pad - B), (0, 0)))

    pool_cols = kp["cwe"].shape[1]                      # OC * P
    fc_in = kp["w1"].shape[0]
    hidden = kp["w1"].shape[1]
    const2 = lambda i: (0, 0)

    out = pl.pallas_call(
        _disc_kernel,
        out_shape=jax.ShapeDtypeStruct((b_pad, 1), jnp.float32),
        grid=(num_tiles,),
        in_specs=[
            pl.BlockSpec((tile_b, L * C), lambda i: (i, 0)),        # history
            pl.BlockSpec((tile_b, S), lambda i: (i, 0)),            # state
            pl.BlockSpec((L * C, pool_cols), const2),               # conv W even
            pl.BlockSpec((L * C, pool_cols), const2),               # conv W odd
            pl.BlockSpec((1, pool_cols), const2),                   # conv bias
            pl.BlockSpec((fc_in, hidden), const2),                  # fc_input W
            pl.BlockSpec((1, hidden), const2),                      # fc_input b
            pl.BlockSpec((hidden, hidden), const2),                 # fc_m1 W
            pl.BlockSpec((1, hidden), const2),                      # fc_m1 b
            pl.BlockSpec((hidden, hidden), const2),                 # fc_m2 W
            pl.BlockSpec((1, hidden), const2),                      # fc_m2 b
            pl.BlockSpec((hidden, hidden), const2),                 # fc_m3 W
            pl.BlockSpec((1, hidden), const2),                      # fc_m3 b
            pl.BlockSpec((1, hidden), const2),                      # fc_out W
            pl.BlockSpec(memory_space=pltpu.MemorySpace.SMEM),      # fc_out b
        ],
        out_specs=pl.BlockSpec((tile_b, 1), lambda i: (i, 0)),
        compiler_params=pltpu.CompilerParams(
            dimension_semantics=("parallel",),
            vmem_limit_bytes=64 * 1024 * 1024),
    )(hist2d, state_f, kp["cwe"], kp["cwo"], kp["cb"],
      kp["w1"], kp["b1"], kp["w2"], kp["b2"],
      kp["w3"], kp["b3"], kp["w4"], kp["b4"],
      kp["w5"], kp["b5"])

    return out[:B]


def reference_forward(params, history, state):
    # Pure-JAX reference mirroring the PyTorch forward exactly (f32).
    x = jnp.swapaxes(history, 1, 2)                          # (B, C, L)
    conv = jax.lax.conv_general_dilated(
        x, params["conv_w"], (1,), "VALID",
        dimension_numbers=("NCH", "OIH", "NCH"))
    conv = conv + params["conv_b"][None, :, None]
    conv = jnp.maximum(jnp.nan_to_num(conv), 0.0)
    B, OC, Lo = conv.shape
    P = (Lo - POOL_K) // POOL_K + 1
    pooled = jnp.max(conv[:, :, :P * POOL_K].reshape(B, OC, P, POOL_K), axis=-1)
    flat = pooled.reshape(B, OC * P)
    out = jnp.concatenate([flat, state], axis=1)

    def lin(p, v):
        return v @ p[0].T + p[1]

    h = jnp.maximum(jnp.nan_to_num(lin(params["fc_input"], out)), 0.0)
    h = jnp.maximum(jnp.nan_to_num(lin(params["fc_m1"], h)), 0.0)
    h = jnp.maximum(jnp.nan_to_num(lin(params["fc_m2"], h)), 0.0)
    h = jnp.maximum(jnp.nan_to_num(lin(params["fc_m3"], h)), 0.0)
    return jax.nn.sigmoid(jnp.nan_to_num(lin(params["fc_out"], h)))


if __name__ == "__main__":
    state_features, action_features, history_length = 4, 4, 8

    key = jax.random.PRNGKey(0)
    kparam, kh1, ks1, kh2, ks2 = jax.random.split(key, 5)
    params = init_params(kparam, state_features, action_features, history_length)
    kparams = prepare_kernel_params(params, history_length)   # one-time layout

    # Single-tile path (grid = 1).
    B = 2
    history = jax.random.normal(
        kh1, (B, history_length, state_features + action_features), jnp.float32)
    state = jax.random.normal(ks1, (B, state_features), jnp.float32)
    out = jax.block_until_ready(discriminator_forward(kparams, history, state))
    ref = reference_forward(params, history, state)
    assert out.shape == (B, 1)
    assert jnp.allclose(out, ref, atol=1e-2, rtol=1e-2), (out, ref)

    # Multi-tile path (grid = 2, batch padding).
    B2 = 40
    history2 = jax.random.normal(
        kh2, (B2, history_length, state_features + action_features), jnp.float32)
    state2 = jax.random.normal(ks2, (B2, state_features), jnp.float32)
    out2 = jax.block_until_ready(discriminator_forward(kparams, history2, state2))
    ref2 = reference_forward(params, history2, state2)
    assert out2.shape == (B2, 1)
    assert jnp.allclose(out2, ref2, atol=1e-2, rtol=1e-2), (out2, ref2)

    print("KERNEL_OK")
</pallas_src>

<mosaic_0001>
module attributes {stable_mosaic.version = 11 : i64} {
  func.func @_disc_kernel(%arg0: i32, %arg1: memref<2x64xbf16, #tpu.memory_space<vmem>>, %arg2: memref<2x4xf32, #tpu.memory_space<vmem>>, %arg3: memref<64x96xbf16, #tpu.memory_space<vmem>>, %arg4: memref<64x96xbf16, #tpu.memory_space<vmem>>, %arg5: memref<1x96xf32, #tpu.memory_space<vmem>>, %arg6: memref<100x512xbf16, #tpu.memory_space<vmem>>, %arg7: memref<1x512xf32, #tpu.memory_space<vmem>>, %arg8: memref<512x512xbf16, #tpu.memory_space<vmem>>, %arg9: memref<1x512xf32, #tpu.memory_space<vmem>>, %arg10: memref<512x512xbf16, #tpu.memory_space<vmem>>, %arg11: memref<1x512xf32, #tpu.memory_space<vmem>>, %arg12: memref<512x512xbf16, #tpu.memory_space<vmem>>, %arg13: memref<1x512xf32, #tpu.memory_space<vmem>>, %arg14: memref<1x512xf32, #tpu.memory_space<vmem>>, %arg15: memref<1xf32, #tpu.memory_space<smem>>, %arg16: memref<2x1xf32, #tpu.memory_space<vmem>>) attributes {dimension_semantics = [#tpu.dimension_semantics<parallel>], iteration_bounds = array<i64: 1>, scalar_prefetch = 0 : i64, scratch_operands = 0 : i64, tpu.core_type = #tpu.core_type<tc>, window_params = [{transform_indices = @transform_0, window_bounds = array<i64: 2, 64>}, {transform_indices = @transform_1, window_bounds = array<i64: 2, 4>}, {pipeline_mode = #tpu.pipeline_mode<synchronous>, transform_indices = @transform_2, window_bounds = array<i64: 64, 96>}, {pipeline_mode = #tpu.pipeline_mode<synchronous>, transform_indices = @transform_3, window_bounds = array<i64: 64, 96>}, {pipeline_mode = #tpu.pipeline_mode<synchronous>, transform_indices = @transform_4, window_bounds = array<i64: 1, 96>}, {pipeline_mode = #tpu.pipeline_mode<synchronous>, transform_indices = @transform_5, window_bounds = array<i64: 100, 512>}, {pipeline_mode = #tpu.pipeline_mode<synchronous>, transform_indices = @transform_6, window_bounds = array<i64: 1, 512>}, {pipeline_mode = #tpu.pipeline_mode<synchronous>, transform_indices = @transform_7, window_bounds = array<i64: 512, 512>}, {pipeline_mode = #tpu.pipeline_mode<synchronous>, transform_indices = @transform_8, window_bounds = array<i64: 1, 512>}, {pipeline_mode = #tpu.pipeline_mode<synchronous>, transform_indices = @transform_9, window_bounds = array<i64: 512, 512>}, {pipeline_mode = #tpu.pipeline_mode<synchronous>, transform_indices = @transform_10, window_bounds = array<i64: 1, 512>}, {pipeline_mode = #tpu.pipeline_mode<synchronous>, transform_indices = @transform_11, window_bounds = array<i64: 512, 512>}, {pipeline_mode = #tpu.pipeline_mode<synchronous>, transform_indices = @transform_12, window_bounds = array<i64: 1, 512>}, {pipeline_mode = #tpu.pipeline_mode<synchronous>, transform_indices = @transform_13, window_bounds = array<i64: 1, 512>}, {transform_indices = @transform_14, window_bounds = array<i64: 1>}, {transform_indices = @transform_15, window_bounds = array<i64: 2, 1>}]} {
    %c0 = arith.constant 0 : index
    %c0_0 = arith.constant 0 : index
    %0 = vector.load %arg1[%c0, %c0_0] : memref<2x64xbf16, #tpu.memory_space<vmem>>, vector<2x64xbf16>
    %c0_1 = arith.constant 0 : index
    %c0_2 = arith.constant 0 : index
    %1 = vector.load %arg3[%c0_1, %c0_2] : memref<64x96xbf16, #tpu.memory_space<vmem>>, vector<64x96xbf16>
    %cst = arith.constant dense<0.000000e+00> : vector<2x96xf32>
    %2 = tpu.matmul %0, %1, %cst {dimension_numbers = #tpu.dot_dimension_numbers<[1], [0], [0], [1], [0, 0, 1, 1], [], []>} : vector<2x64xbf16>, vector<64x96xbf16>, vector<2x96xf32> -> vector<2x96xf32>
    %c0_3 = arith.constant 0 : index
    %c0_4 = arith.constant 0 : index
    %3 = vector.load %arg4[%c0_3, %c0_4] : memref<64x96xbf16, #tpu.memory_space<vmem>>, vector<64x96xbf16>
    %cst_5 = arith.constant dense<0.000000e+00> : vector<2x96xf32>
    %4 = tpu.matmul %0, %3, %cst_5 {dimension_numbers = #tpu.dot_dimension_numbers<[1], [0], [0], [1], [0, 0, 1, 1], [], []>} : vector<2x64xbf16>, vector<64x96xbf16>, vector<2x96xf32> -> vector<2x96xf32>
    %5 = arith.cmpf ogt, %2, %4 : vector<2x96xf32>
    %6 = arith.cmpf one, %4, %4 : vector<2x96xf32>
    %7 = arith.ori %5, %6 : vector<2x96xi1>
    %8 = arith.select %7, %2, %4 : vector<2x96xi1>, vector<2x96xf32>
    %c0_6 = arith.constant 0 : index
    %c0_7 = arith.constant 0 : index
    %9 = vector.load %arg5[%c0_6, %c0_7] : memref<1x96xf32, #tpu.memory_space<vmem>>, vector<1x96xf32>
    %10 = vector.broadcast %9 : vector<1x96xf32> to vector<2x96xf32>
    %11 = arith.addf %8, %10 : vector<2x96xf32>
    %cst_8 = arith.constant 0.000000e+00 : f32
    %12 = vector.broadcast %cst_8 : f32 to vector<2x96xf32>
    %13 = arith.cmpf ogt, %11, %12 : vector<2x96xf32>
    %cst_9 = arith.constant 0.000000e+00 : f32
    %14 = vector.broadcast %cst_9 : f32 to vector<2x96xf32>
    %15 = arith.select %13, %11, %14 : vector<2x96xi1>, vector<2x96xf32>
    %cst_10 = arith.constant 3.40282347E+38 : f32
    %16 = vector.broadcast %cst_10 : f32 to vector<2x96xf32>
    %17 = arith.minimumf %15, %16 : vector<2x96xf32>
    %c0_11 = arith.constant 0 : index
    %c0_12 = arith.constant 0 : index
    %18 = vector.load %arg2[%c0_11, %c0_12] : memref<2x4xf32, #tpu.memory_space<vmem>>, vector<2x4xf32>
    %19 = tpu.concatenate %17, %18 in 1 : vector<2x96xf32>, vector<2x4xf32> -> vector<2x100xf32>
    %20 = arith.truncf %19 : vector<2x100xf32> to vector<2x100xbf16>
    %c0_13 = arith.constant 0 : index
    %c0_14 = arith.constant 0 : index
    %21 = vector.load %arg6[%c0_13, %c0_14] : memref<100x512xbf16, #tpu.memory_space<vmem>>, vector<100x512xbf16>
    %cst_15 = arith.constant dense<0.000000e+00> : vector<2x512xf32>
    %22 = tpu.matmul %20, %21, %cst_15 {dimension_numbers = #tpu.dot_dimension_numbers<[1], [0], [0], [1], [0, 0, 1, 1], [], []>} : vector<2x100xbf16>, vector<100x512xbf16>, vector<2x512xf32> -> vector<2x512xf32>
    %c0_16 = arith.constant 0 : index
    %c0_17 = arith.constant 0 : index
    %23 = vector.load %arg7[%c0_16, %c0_17] : memref<1x512xf32, #tpu.memory_space<vmem>>, vector<1x512xf32>
    %24 = vector.broadcast %23 : vector<1x512xf32> to vector<2x512xf32>
    %25 = arith.addf %22, %24 : vector<2x512xf32>
    %cst_18 = arith.constant 0.000000e+00 : f32
    %26 = vector.broadcast %cst_18 : f32 to vector<2x512xf32>
    %27 = arith.cmpf ogt, %25, %26 : vector<2x512xf32>
    %cst_19 = arith.constant 0.000000e+00 : f32
    %28 = vector.broadcast %cst_19 : f32 to vector<2x512xf32>
    %29 = arith.select %27, %25, %28 : vector<2x512xi1>, vector<2x512xf32>
    %cst_20 = arith.constant 3.40282347E+38 : f32
    %30 = vector.broadcast %cst_20 : f32 to vector<2x512xf32>
    %31 = arith.minimumf %29, %30 : vector<2x512xf32>
    %32 = arith.truncf %31 : vector<2x512xf32> to vector<2x512xbf16>
    %c0_21 = arith.constant 0 : index
    %c0_22 = arith.constant 0 : index
    %33 = vector.load %arg8[%c0_21, %c0_22] : memref<512x512xbf16, #tpu.memory_space<vmem>>, vector<512x512xbf16>
    %cst_23 = arith.constant dense<0.000000e+00> : vector<2x512xf32>
    %34 = tpu.matmul %32, %33, %cst_23 {dimension_numbers = #tpu.dot_dimension_numbers<[1], [0], [0], [1], [0, 0, 1, 1], [], []>} : vector<2x512xbf16>, vector<512x512xbf16>, vector<2x512xf32> -> vector<2x512xf32>
    %c0_24 = arith.constant 0 : index
    %c0_25 = arith.constant 0 : index
    %35 = vector.load %arg9[%c0_24, %c0_25] : memref<1x512xf32, #tpu.memory_space<vmem>>, vector<1x512xf32>
    %36 = vector.broadcast %35 : vector<1x512xf32> to vector<2x512xf32>
    %37 = arith.addf %34, %36 : vector<2x512xf32>
    %cst_26 = arith.constant 0.000000e+00 : f32
    %38 = vector.broadcast %cst_26 : f32 to vector<2x512xf32>
    %39 = arith.cmpf ogt, %37, %38 : vector<2x512xf32>
    %cst_27 = arith.constant 0.000000e+00 : f32
    %40 = vector.broadcast %cst_27 : f32 to vector<2x512xf32>
    %41 = arith.select %39, %37, %40 : vector<2x512xi1>, vector<2x512xf32>
    %cst_28 = arith.constant 3.40282347E+38 : f32
    %42 = vector.broadcast %cst_28 : f32 to vector<2x512xf32>
    %43 = arith.minimumf %41, %42 : vector<2x512xf32>
    %44 = arith.truncf %43 : vector<2x512xf32> to vector<2x512xbf16>
    %c0_29 = arith.constant 0 : index
    %c0_30 = arith.constant 0 : index
    %45 = vector.load %arg10[%c0_29, %c0_30] : memref<512x512xbf16, #tpu.memory_space<vmem>>, vector<512x512xbf16>
    %cst_31 = arith.constant dense<0.000000e+00> : vector<2x512xf32>
    %46 = tpu.matmul %44, %45, %cst_31 {dimension_numbers = #tpu.dot_dimension_numbers<[1], [0], [0], [1], [0, 0, 1, 1], [], []>} : vector<2x512xbf16>, vector<512x512xbf16>, vector<2x512xf32> -> vector<2x512xf32>
    %c0_32 = arith.constant 0 : index
    %c0_33 = arith.constant 0 : index
    %47 = vector.load %arg11[%c0_32, %c0_33] : memref<1x512xf32, #tpu.memory_space<vmem>>, vector<1x512xf32>
    %48 = vector.broadcast %47 : vector<1x512xf32> to vector<2x512xf32>
    %49 = arith.addf %46, %48 : vector<2x512xf32>
    %cst_34 = arith.constant 0.000000e+00 : f32
    %50 = vector.broadcast %cst_34 : f32 to vector<2x512xf32>
    %51 = arith.cmpf ogt, %49, %50 : vector<2x512xf32>
    %cst_35 = arith.constant 0.000000e+00 : f32
    %52 = vector.broadcast %cst_35 : f32 to vector<2x512xf32>
    %53 = arith.select %51, %49, %52 : vector<2x512xi1>, vector<2x512xf32>
    %cst_36 = arith.constant 3.40282347E+38 : f32
    %54 = vector.broadcast %cst_36 : f32 to vector<2x512xf32>
    %55 = arith.minimumf %53, %54 : vector<2x512xf32>
    %56 = arith.truncf %55 : vector<2x512xf32> to vector<2x512xbf16>
    %c0_37 = arith.constant 0 : index
    %c0_38 = arith.constant 0 : index
    %57 = vector.load %arg12[%c0_37, %c0_38] : memref<512x512xbf16, #tpu.memory_space<vmem>>, vector<512x512xbf16>
    %cst_39 = arith.constant dense<0.000000e+00> : vector<2x512xf32>
    %58 = tpu.matmul %56, %57, %cst_39 {dimension_numbers = #tpu.dot_dimension_numbers<[1], [0], [0], [1], [0, 0, 1, 1], [], []>} : vector<2x512xbf16>, vector<512x512xbf16>, vector<2x512xf32> -> vector<2x512xf32>
    %c0_40 = arith.constant 0 : index
    %c0_41 = arith.constant 0 : index
    %59 = vector.load %arg13[%c0_40, %c0_41] : memref<1x512xf32, #tpu.memory_space<vmem>>, vector<1x512xf32>
    %60 = vector.broadcast %59 : vector<1x512xf32> to vector<2x512xf32>
    %61 = arith.addf %58, %60 : vector<2x512xf32>
    %cst_42 = arith.constant 0.000000e+00 : f32
    %62 = vector.broadcast %cst_42 : f32 to vector<2x512xf32>
    %63 = arith.cmpf ogt, %61, %62 : vector<2x512xf32>
    %cst_43 = arith.constant 0.000000e+00 : f32
    %64 = vector.broadcast %cst_43 : f32 to vector<2x512xf32>
    %65 = arith.select %63, %61, %64 : vector<2x512xi1>, vector<2x512xf32>
    %cst_44 = arith.constant 3.40282347E+38 : f32
    %66 = vector.broadcast %cst_44 : f32 to vector<2x512xf32>
    %67 = arith.minimumf %65, %66 : vector<2x512xf32>
    %68 = arith.truncf %67 : vector<2x512xf32> to vector<2x512xbf16>
    %c0_45 = arith.constant 0 : index
    %c0_46 = arith.constant 0 : index
    %69 = vector.load %arg14[%c0_45, %c0_46] : memref<1x512xf32, #tpu.memory_space<vmem>>, vector<1x512xf32>
    %70 = arith.extf %68 : vector<2x512xbf16> to vector<2x512xf32>
    %71 = vector.broadcast %69 : vector<1x512xf32> to vector<2x512xf32>
    %72 = arith.mulf %70, %71 : vector<2x512xf32>
    %cst_47 = arith.constant dense<0.000000e+00> : vector<2xf32>
    %73 = vector.multi_reduction <add>, %72, %cst_47 [1] : vector<2x512xf32> to vector<2xf32>
    %74 = vector.shape_cast %73 : vector<2xf32> to vector<2x1xf32>
    %c0_48 = arith.constant 0 : index
    %75 = memref.load %arg15[%c0_48] : memref<1xf32, #tpu.memory_space<smem>>
    %76 = vector.broadcast %75 : f32 to vector<2x1xf32>
    %77 = arith.addf %74, %76 : vector<2x1xf32>
    %78 = arith.cmpf one, %77, %77 : vector<2x1xf32>
    %cst_49 = arith.constant 0.000000e+00 : f32
    %79 = vector.broadcast %cst_49 : f32 to vector<2x1xf32>
    %80 = arith.select %78, %79, %77 : vector<2x1xi1>, vector<2x1xf32>
    %cst_50 = arith.constant 0x7F800000 : f32
    %81 = vector.broadcast %cst_50 : f32 to vector<2x1xf32>
    %82 = arith.cmpf oeq, %80, %81 : vector<2x1xf32>
    %cst_51 = arith.constant 3.40282347E+38 : f32
    %83 = vector.broadcast %cst_51 : f32 to vector<2x1xf32>
    %84 = arith.select %82, %83, %80 : vector<2x1xi1>, vector<2x1xf32>
    %cst_52 = arith.constant 0xFF800000 : f32
    %85 = vector.broadcast %cst_52 : f32 to vector<2x1xf32>
    %86 = arith.cmpf oeq, %84, %85 : vector<2x1xf32>
    %cst_53 = arith.constant -3.40282347E+38 : f32
    %87 = vector.broadcast %cst_53 : f32 to vector<2x1xf32>
    %88 = arith.select %86, %87, %84 : vector<2x1xi1>, vector<2x1xf32>
    %cst_54 = arith.constant 0.000000e+00 : f32
    %89 = vector.broadcast %cst_54 : f32 to vector<2x1xf32>
    %90 = arith.subf %89, %88 : vector<2x1xf32>
    %91 = math.exp %90 : vector<2x1xf32>
    %cst_55 = arith.constant 1.000000e+00 : f32
    %92 = vector.broadcast %cst_55 : f32 to vector<2x1xf32>
    %93 = arith.addf %92, %91 : vector<2x1xf32>
    %94 = tpu.reciprocal %93 {approx = true} : vector<2x1xf32> -> vector<2x1xf32>
    %c0_56 = arith.constant 0 : index
    %c0_57 = arith.constant 0 : index
    %95 = vector.load %arg16[%c0_56, %c0_57] : memref<2x1xf32, #tpu.memory_space<vmem>>, vector<2x1xf32>
    tpu.vector_store %arg16[%c0_56, %c0_57], %94 {strides = array<i32>} : memref<2x1xf32, #tpu.memory_space<vmem>>, vector<2x1xf32>,
    return
  }
  func.func @transform_0(%arg0: i32) -> (i32, i32) {
    %c0_i32 = arith.constant 0 : i32
    %c0_i32_0 = arith.constant 0 : i32
    return %arg0, %c0_i32 : i32, i32
  }
  func.func @transform_1(%arg0: i32) -> (i32, i32) {
    %c0_i32 = arith.constant 0 : i32
    %c0_i32_0 = arith.constant 0 : i32
    return %arg0, %c0_i32 : i32, i32
  }
  func.func @transform_2(%arg0: i32) -> (i32, i32) {
    %c0_i32 = arith.constant 0 : i32
    %c0_i32_0 = arith.constant 0 : i32
    %c0_i32_1 = arith.constant 0 : i32
    return %c0_i32, %c0_i32_0 : i32, i32
  }
  func.func @transform_3(%arg0: i32) -> (i32, i32) {
    %c0_i32 = arith.constant 0 : i32
    %c0_i32_0 = arith.constant 0 : i32
    %c0_i32_1 = arith.constant 0 : i32
    return %c0_i32, %c0_i32_0 : i32, i32
  }
  func.func @transform_4(%arg0: i32) -> (i32, i32) {
    %c0_i32 = arith.constant 0 : i32
    %c0_i32_0 = arith.constant 0 : i32
    %c0_i32_1 = arith.constant 0 : i32
    return %c0_i32, %c0_i32_0 : i32, i32
  }
  func.func @transform_5(%arg0: i32) -> (i32, i32) {
    %c0_i32 = arith.constant 0 : i32
    %c0_i32_0 = arith.constant 0 : i32
    %c0_i32_1 = arith.constant 0 : i32
    return %c0_i32, %c0_i32_0 : i32, i32
  }
  func.func @transform_6(%arg0: i32) -> (i32, i32) {
    %c0_i32 = arith.constant 0 : i32
    %c0_i32_0 = arith.constant 0 : i32
    %c0_i32_1 = arith.constant 0 : i32
    return %c0_i32, %c0_i32_0 : i32, i32
  }
  func.func @transform_7(%arg0: i32) -> (i32, i32) {
    %c0_i32 = arith.constant 0 : i32
    %c0_i32_0 = arith.constant 0 : i32
    %c0_i32_1 = arith.constant 0 : i32
    return %c0_i32, %c0_i32_0 : i32, i32
  }
  func.func @transform_8(%arg0: i32) -> (i32, i32) {
    %c0_i32 = arith.constant 0 : i32
    %c0_i32_0 = arith.constant 0 : i32
    %c0_i32_1 = arith.constant 0 : i32
    return %c0_i32, %c0_i32_0 : i32, i32
  }
  func.func @transform_9(%arg0: i32) -> (i32, i32) {
    %c0_i32 = arith.constant 0 : i32
    %c0_i32_0 = arith.constant 0 : i32
    %c0_i32_1 = arith.constant 0 : i32
    return %c0_i32, %c0_i32_0 : i32, i32
  }
  func.func @transform_10(%arg0: i32) -> (i32, i32) {
    %c0_i32 = arith.constant 0 : i32
    %c0_i32_0 = arith.constant 0 : i32
    %c0_i32_1 = arith.constant 0 : i32
    return %c0_i32, %c0_i32_0 : i32, i32
  }
  func.func @transform_11(%arg0: i32) -> (i32, i32) {
    %c0_i32 = arith.constant 0 : i32
    %c0_i32_0 = arith.constant 0 : i32
    %c0_i32_1 = arith.constant 0 : i32
    return %c0_i32, %c0_i32_0 : i32, i32
  }
  func.func @transform_12(%arg0: i32) -> (i32, i32) {
    %c0_i32 = arith.constant 0 : i32
    %c0_i32_0 = arith.constant 0 : i32
    %c0_i32_1 = arith.constant 0 : i32
    return %c0_i32, %c0_i32_0 : i32, i32
  }
  func.func @transform_13(%arg0: i32) -> (i32, i32) {
    %c0_i32 = arith.constant 0 : i32
    %c0_i32_0 = arith.constant 0 : i32
    %c0_i32_1 = arith.constant 0 : i32
    return %c0_i32, %c0_i32_0 : i32, i32
  }
  func.func @transform_14(%arg0: i32) -> i32 {
    %c0_i32 = arith.constant 0 : i32
    %c0_i32_0 = arith.constant 0 : i32
    return %c0_i32 : i32
  }
  func.func @transform_15(%arg0: i32) -> (i32, i32) {
    %c0_i32 = arith.constant 0 : i32
    %c0_i32_0 = arith.constant 0 : i32
    return %arg0, %c0_i32 : i32, i32
  }
}

</mosaic_0001>

<bundles_post_ra>
// kernel: discriminator_forward.1
= control target key start
LH: loop header
LB: loop body
LE: loop exit
PB: predicated region body
PF: predicated region fallthrough
CT: control target
= control target key end

     0   :  { %21 = vsyncpa [#allocation4], 0  ;;  %s5548_s0 = inlined_call_operand.hbm [shape: bf16[2,64], index: 0, kind: input, shape index: {}]   ;;  %s5549_s1 = inlined_call_operand.hbm [shape: f32[2,4], index: 1, kind: input, shape index: {}]   ;;  %s5550_s2 = inlined_call_operand.hbm [shape: bf16[64,96], index: 2, kind: input, shape index: {}]   ;;  %s5551_s3 = inlined_call_operand.hbm [shape: bf16[64,96], index: 3, kind: input, shape index: {}]   ;;  %s5552_s4 = inlined_call_operand.hbm [shape: f32[1,96], index: 4, kind: input, shape index: {}]   ;;  %s5553_s5 = inlined_call_operand.hbm [shape: bf16[100,512], index: 5, kind: input, shape index: {}]   ;;  %s5554_s6 = inlined_call_operand.hbm [shape: f32[1,512], index: 6, kind: input, shape index: {}]   ;;  %s5555_s7 = inlined_call_operand.hbm [shape: bf16[512,512], index: 7, kind: input, shape index: {}]   ;;  %s5556_s8 = inlined_call_operand.hbm [shape: f32[1,512], index: 8, kind: input, shape index: {}]   ;;  %s5557_s9 = inlined_call_operand.hbm [shape: bf16[512,512], index: 9, kind: input, shape index: {}]   ;;  %s5558_s10 = inlined_call_operand.hbm [shape: f32[1,512], index: 10, kind: input, shape index: {}]   ;;  %s5559_s11 = inlined_call_operand.hbm [shape: bf16[512,512], index: 11, kind: input, shape index: {}]   ;;  %s5560_s12 = inlined_call_operand.hbm [shape: f32[1,512], index: 12, kind: input, shape index: {}]   ;;  %s5561_s13 = inlined_call_operand.hbm [shape: f32[1,512], index: 13, kind: input, shape index: {}]   ;;  %s5562_s14 = inlined_call_operand.<no memory space> [shape: f32[1], index: 14, kind: input, shape index: {}]   ;;  %s5563_s15 = inlined_call_operand.hbm [shape: f32[2,1], index: 15, kind: output, shape index: {}]  }
   0x1   :  { %22 = vsyncpa [#allocation7], 0 }
   0x2   :  { %23 = vsyncpa [#allocation10], 0 }
   0x3   :  { %24 = vsyncpa [#allocation13], 0 }
   0x4   :  { %25 = vsyncpa [#allocation16], 0 }
   0x5   :  { %26 = vsyncpa [#allocation19], 0 }
   0x6   :  { %27 = vsyncpa [#allocation22], 0 }
   0x7   :  { %28 = vsyncpa [#allocation25], 0 }
   0x8   :  { %29 = vsyncpa [#allocation5], 0  ;;  %s5175_s18 = smov [#allocation6]   ;;  %s4827_s22 = scalar_lea.hbm %s5549_s1, 32 }
   0x9   :  { %s46_s19 = sshll.u32 %s5175_s18, 4  ;;  %p4828_p0 = scmp.ne.s32.totalorder %s5549_s1, %s4827_s22  ;;  %s47_s19 = int_to_ptr.vmem [resolvable:$true] %s46_s19 }
   0xa   :  { %p4831_p1 = scmp.lt.u32.totalorder %s4827_s22, %s5549_s1 }
   0xc   :  { %p4833_p2 = pnand %p4831_p1, %p4828_p0 }
   0xe   :  { %4836 = shalt.err (!%p4833_p2)
}
   0xf   :  { %s4837_s27 = scalar_lea.vmem %s47_s19, 32  ;;  %p4842_p4 = scmp.lt.s32.totalorder %s47_s19, %s47_s19 }
  0x10   :  { %p4838_p3 = scmp.ne.s32.totalorder %s47_s19, %s4837_s27  ;;  %p4843_p5 = scmp.lt.s32.totalorder %s4837_s27, %s4837_s27 }
  0x12   :  { %p4844_p6 = por %p4843_p5, %p4842_p4 }
  0x14   :  { %p4845_p7 = pnand %p4844_p6, %p4838_p3 }
  0x16   :  { %4848 = shalt.err (!%p4845_p7)
}
  0x17   :  { %49 = dma.hbm_to_vmem [thread:$0]  %s5549_s1, 32, %s47_s19, [#allocation7]  }
  0x18   :  { %s5176_s30 = smov [#allocation9]   ;;  %s5177_s17 = smov [#allocation12]  }
  0x19   :  { %s67_s16 = sshll.u32 %s5176_s30, 4  ;;  %s89_s18 = sshll.u32 %s5177_s17, 4  ;;  %s68_s16 = int_to_ptr.vmem [resolvable:$true] %s67_s16  ;;  %s90_s18 = int_to_ptr.vmem [resolvable:$true] %s89_s18 }
  0x1a   :  { %s4849_s22 = scalar_lea.hbm %s5551_s3, 512 }
  0x1b   :  { %p4850_p8 = scmp.ne.s32.totalorder %s5551_s3, %s4849_s22  ;;  %p4853_p9 = scmp.lt.u32.totalorder %s4849_s22, %s5551_s3 }
  0x1d   :  { %p4855_p10 = pnand %p4853_p9, %p4850_p8 }
  0x1f   :  { %4858 = shalt.err (!%p4855_p10)
}
  0x20   :  { %s4859_s1 = scalar_lea.vmem %s68_s16, 512  ;;  %p4864_p12 = scmp.lt.s32.totalorder %s68_s16, %s68_s16 }
  0x21   :  { %p4860_p11 = scmp.ne.s32.totalorder %s68_s16, %s4859_s1  ;;  %p4865_p13 = scmp.lt.s32.totalorder %s4859_s1, %s4859_s1 }
  0x23   :  { %p4866_p0 = por %p4865_p13, %p4864_p12 }
  0x25   :  { %p4867_p1 = pnand %p4866_p0, %p4860_p11 }
  0x27   :  { %4870 = shalt.err (!%p4867_p1)
}
  0x28   :  { %s5564_s19 = smov 64   ;;  %s5179_s27 = smov 4  }
  0x29   :  { %73 = dma.hbm_to_vmem [thread:$0]  %s5551_s3, 512, %s68_s16, [#allocation10], %s5564_s19, %s5564_s19, %s5179_s27  }
  0x2a   :  { %s4871_s20 = scalar_lea.hbm %s5553_s5, 3328 }
  0x2b   :  { %p4872_p2 = scmp.ne.s32.totalorder %s5553_s5, %s4871_s20  ;;  %p4875_p3 = scmp.lt.u32.totalorder %s4871_s20, %s5553_s5 }
  0x2d   :  { %p4877_p4 = pnand %p4875_p3, %p4872_p2 }
  0x2f   :  { %4880 = shalt.err (!%p4877_p4)
}
  0x30   :  { %s4881_s25 = scalar_lea.vmem %s90_s18, 3328  ;;  %p4886_p6 = scmp.lt.s32.totalorder %s90_s18, %s90_s18 }
  0x31   :  { %p4882_p5 = scmp.ne.s32.totalorder %s90_s18, %s4881_s25  ;;  %p4887_p7 = scmp.lt.s32.totalorder %s4881_s25, %s4881_s25 }
  0x33   :  { %p4888_p8 = por %p4887_p7, %p4886_p6 }
  0x35   :  { %p4889_p9 = pnand %p4888_p8, %p4882_p5 }
  0x37   :  { %4892 = shalt.err (!%p4889_p9)
}
  0x38   :  { %s5180_s3 = smov 256   ;;  %s5181_s16 = smov 16  }
  0x39   :  { %95 = dma.hbm_to_vmem [thread:$0]  %s5553_s5, 3328, %s90_s18, [#allocation13], %s5180_s3, %s5180_s3, %s5181_s16  }
  0x3a   :  { %s5182_s28 = smov [#allocation15]   ;;  %s5183_s30 = smov [#allocation18]  }
  0x3b   :  { %s111_s29 = sshll.u32 %s5182_s28, 4  ;;  %s133_s17 = sshll.u32 %s5183_s30, 4  ;;  %s112_s29 = int_to_ptr.vmem [resolvable:$true] %s111_s29  ;;  %s134_s17 = int_to_ptr.vmem [resolvable:$true] %s133_s17 }
  0x3c   :  { %s4893_s22 = scalar_lea.hbm %s5555_s7, 16384 }
  0x3d   :  { %p4894_p10 = scmp.ne.s32.totalorder %s5555_s7, %s4893_s22  ;;  %p4897_p11 = scmp.lt.u32.totalorder %s4893_s22, %s5555_s7 }
  0x3f   :  { %p4899_p12 = pnand %p4897_p11, %p4894_p10 }
  0x41   :  { %4902 = shalt.err (!%p4899_p12)
}
  0x42   :  { %s4903_s5 = scalar_lea.vmem %s112_s29, 16384  ;;  %p4908_p0 = scmp.lt.s32.totalorder %s112_s29, %s112_s29 }
  0x43   :  { %p4904_p13 = scmp.ne.s32.totalorder %s112_s29, %s4903_s5  ;;  %p4909_p1 = scmp.lt.s32.totalorder %s4903_s5, %s4903_s5 }
  0x45   :  { %p4910_p2 = por %p4909_p1, %p4908_p0 }
  0x47   :  { %p4911_p3 = pnand %p4910_p2, %p4904_p13 }
  0x49   :  { %4914 = shalt.err (!%p4911_p3)
}
  0x4a   :  { %117 = dma.hbm_to_vmem [thread:$0]  %s5555_s7, 16384, %s112_s29, [#allocation16], %s5180_s3, %s5180_s3, %s5181_s16  }
  0x4b   :  { %s4915_s28 = scalar_lea.hbm %s5557_s9, 16384 }
  0x4c   :  { %p4916_p4 = scmp.ne.s32.totalorder %s5557_s9, %s4915_s28  ;;  %p4919_p5 = scmp.lt.u32.totalorder %s4915_s28, %s5557_s9 }
  0x4e   :  { %p4921_p6 = pnand %p4919_p5, %p4916_p4 }
  0x50   :  { %4924 = shalt.err (!%p4921_p6)
}
  0x51   :  { %s4925_s23 = scalar_lea.vmem %s134_s17, 16384  ;;  %p4930_p8 = scmp.lt.s32.totalorder %s134_s17, %s134_s17 }
  0x52   :  { %p4926_p7 = scmp.ne.s32.totalorder %s134_s17, %s4925_s23  ;;  %p4931_p9 = scmp.lt.s32.totalorder %s4925_s23, %s4925_s23 }
  0x54   :  { %p4932_p10 = por %p4931_p9, %p4930_p8 }
  0x56   :  { %p4933_p11 = pnand %p4932_p10, %p4926_p7 }
  0x58   :  { %4936 = shalt.err (!%p4933_p11)
}
  0x59   :  { %139 = dma.hbm_to_vmem [thread:$0]  %s5557_s9, 16384, %s134_s17, [#allocation19], %s5180_s3, %s5180_s3, %s5181_s16  }
  0x5a   :  { %s5184_s24 = smov [#allocation21]   ;;  %s5185_s5 = smov [#allocation3]  }
  0x5b   :  { %s155_s25 = sshll.u32 %s5184_s24, 4  ;;  %s36_s18 = sshll.u32 %s5185_s5, 4  ;;  %s156_s25 = int_to_ptr.vmem [resolvable:$true] %s155_s25  ;;  %s37_s18 = int_to_ptr.vmem [resolvable:$true] %s36_s18 }
  0x5c   :  { %s4937_s19 = scalar_lea.hbm %s5559_s11, 16384 }
  0x5d   :  { %p4938_p12 = scmp.ne.s32.totalorder %s5559_s11, %s4937_s19  ;;  %p4941_p13 = scmp.lt.u32.totalorder %s4937_s19, %s5559_s11 }
  0x5f   :  { %p4943_p0 = pnand %p4941_p13, %p4938_p12 }
  0x61   :  { %4946 = shalt.err (!%p4943_p0)
}
  0x62   :  { %s4947_s9 = scalar_lea.vmem %s156_s25, 16384  ;;  %p4952_p2 = scmp.lt.s32.totalorder %s156_s25, %s156_s25 }
  0x63   :  { %p4948_p1 = scmp.ne.s32.totalorder %s156_s25, %s4947_s9  ;;  %p4953_p3 = scmp.lt.s32.totalorder %s4947_s9, %s4947_s9 }
  0x65   :  { %p4954_p4 = por %p4953_p3, %p4952_p2 }
  0x67   :  { %p4955_p5 = pnand %p4954_p4, %p4948_p1 }
  0x69   :  { %4958 = shalt.err (!%p4955_p5)
}
  0x6a   :  { %161 = dma.hbm_to_vmem [thread:$0]  %s5559_s11, 16384, %s156_s25, [#allocation22], %s5180_s3, %s5180_s3, %s5181_s16  }
  0x6b   :  { %s4959_s29 = scalar_lea.hbm %s5548_s0, 16 }
  0x6c   :  { %p4960_p6 = scmp.ne.s32.totalorder %s5548_s0, %s4959_s29  ;;  %p4963_p7 = scmp.lt.u32.totalorder %s4959_s29, %s5548_s0 }
  0x6e   :  { %p4965_p8 = pnand %p4963_p7, %p4960_p6 }
  0x70   :  { %4968 = shalt.err (!%p4965_p8)
}
  0x71   :  { %s4969_s19 = scalar_lea.vmem %s37_s18, 16  ;;  %s4973_s28 = scalar_lea.vmem %s37_s18, 32 }
  0x72   :  { %p4970_p9 = scmp.ne.s32.totalorder %s37_s18, %s4969_s19  ;;  %p4974_p10 = scmp.lt.s32.totalorder %s37_s18, %s37_s18 }
  0x73   :  { %p4975_p11 = scmp.lt.s32.totalorder %s4973_s28, %s4969_s19 }
  0x75   :  { %p4976_p12 = por %p4975_p11, %p4974_p10 }
  0x77   :  { %p4977_p13 = pnand %p4976_p12, %p4970_p9 }
  0x79   :  { %4980 = shalt.err (!%p4977_p13)
}
  0x7a   :  { %39 = dma.hbm_to_vmem [thread:$0]  %s5548_s0, 16, %s37_s18, [#allocation4]  }
  0x7b   :  { %s5186_s16 = smov [#allocation8]   ;;  %s5187_s30 = smov [#allocation11]  }
  0x7c   :  { %s55_s25 = sshll.u32 %s5186_s16, 4  ;;  %s80_s20 = sshll.u32 %s5187_s30, 4  ;;  %s56_s25 = int_to_ptr.vmem [resolvable:$true] %s55_s25  ;;  %s81_s20 = int_to_ptr.vmem [resolvable:$true] %s80_s20 }
  0x7d   :  { %s4981_s17 = scalar_lea.hbm %s5550_s2, 512 }
  0x7e   :  { %p4982_p0 = scmp.ne.s32.totalorder %s5550_s2, %s4981_s17  ;;  %p4985_p1 = scmp.lt.u32.totalorder %s4981_s17, %s5550_s2 }
  0x80   :  { %p4987_p2 = pnand %p4985_p1, %p4982_p0 }
  0x82   :  { %4990 = shalt.err (!%p4987_p2)
}
  0x83   :  { %s4991_s0 = scalar_lea.vmem %s56_s25, 512  ;;  %p4996_p4 = scmp.lt.s32.totalorder %s56_s25, %s56_s25 }
  0x84   :  { %p4992_p3 = scmp.ne.s32.totalorder %s56_s25, %s4991_s0  ;;  %p4997_p5 = scmp.lt.s32.totalorder %s4991_s0, %s4991_s0 }
  0x86   :  { %p4998_p6 = por %p4997_p5, %p4996_p4 }
  0x88   :  { %p4999_p7 = pnand %p4998_p6, %p4992_p3 }
  0x8a   :  { %5002 = shalt.err (!%p4999_p7)
}
  0x8b   :  { %s5565_s18 = smov 64   ;;  %s5003_s19 = scalar_lea.hbm %s5552_s4, 16 }
  0x8c   :  { %61 = dma.hbm_to_vmem [thread:$0]  %s5550_s2, 512, %s56_s25, [#allocation7], %s5565_s18, %s5565_s18, %s5179_s27  }
  0x8d   :  { %p5004_p8 = scmp.ne.s32.totalorder %s5552_s4, %s5003_s19  ;;  %p5007_p9 = scmp.lt.u32.totalorder %s5003_s19, %s5552_s4 }
  0x8f   :  { %p5009_p10 = pnand %p5007_p9, %p5004_p8 }
  0x91   :  { %5012 = shalt.err (!%p5009_p10)
}
  0x92   :  { %s5013_s30 = scalar_lea.vmem %s81_s20, 16  ;;  %s5017_s21 = scalar_lea.vmem %s81_s20, 32 }
  0x93   :  { %p5014_p11 = scmp.ne.s32.totalorder %s81_s20, %s5013_s30  ;;  %p5018_p12 = scmp.lt.s32.totalorder %s81_s20, %s81_s20 }
  0x94   :  { %p5019_p13 = scmp.lt.s32.totalorder %s5017_s21, %s5013_s30 }
  0x96   :  { %p5020_p0 = por %p5019_p13, %p5018_p12 }
  0x98   :  { %p5021_p1 = pnand %p5020_p0, %p5014_p11 }
  0x9a   :  { %5024 = shalt.err (!%p5021_p1)
}
  0x9b   :  { %83 = dma.hbm_to_vmem [thread:$0]  %s5552_s4, 16, %s81_s20, [#allocation10]  }
  0x9c   :  { %s5188_s25 = smov [#allocation14]   ;;  %s5189_s17 = smov [#allocation17]  }
  0x9d   :  { %s102_s9 = sshll.u32 %s5188_s25, 4  ;;  %s124_s22 = sshll.u32 %s5189_s17, 4  ;;  %s103_s9 = int_to_ptr.vmem [resolvable:$true] %s102_s9  ;;  %s125_s22 = int_to_ptr.vmem [resolvable:$true] %s124_s22 }
  0x9e   :  { %s5025_s29 = scalar_lea.hbm %s5554_s6, 64 }
  0x9f   :  { %p5026_p2 = scmp.ne.s32.totalorder %s5554_s6, %s5025_s29  ;;  %p5029_p3 = scmp.lt.u32.totalorder %s5025_s29, %s5554_s6 }
  0xa1   :  { %p5031_p4 = pnand %p5029_p3, %p5026_p2 }
  0xa3   :  { %5034 = shalt.err (!%p5031_p4)
}
  0xa4   :  { %s5035_s4 = scalar_lea.vmem %s103_s9, 64  ;;  %p5040_p6 = scmp.lt.s32.totalorder %s103_s9, %s103_s9 }
  0xa5   :  { %p5036_p5 = scmp.ne.s32.totalorder %s103_s9, %s5035_s4  ;;  %p5041_p7 = scmp.lt.s32.totalorder %s5035_s4, %s5035_s4 }
  0xa7   :  { %p5042_p8 = por %p5041_p7, %p5040_p6 }
  0xa9   :  { %p5043_p9 = pnand %p5042_p8, %p5036_p5 }
  0xab   :  { %5046 = shalt.err (!%p5043_p9)
}
  0xac   :  { %105 = dma.hbm_to_vmem [thread:$0]  %s5554_s6, 64, %s103_s9, [#allocation13]  }
  0xad   :  { %s5047_s28 = scalar_lea.hbm %s5556_s8, 64 }
  0xae   :  { %p5048_p10 = scmp.ne.s32.totalorder %s5556_s8, %s5047_s28  ;;  %p5051_p11 = scmp.lt.u32.totalorder %s5047_s28, %s5556_s8 }
  0xb0   :  { %p5053_p12 = pnand %p5051_p11, %p5048_p10 }
  0xb2   :  { %5056 = shalt.err (!%p5053_p12)
}
  0xb3   :  { %s5057_s21 = scalar_lea.vmem %s125_s22, 64  ;;  %p5062_p0 = scmp.lt.s32.totalorder %s125_s22, %s125_s22 }
  0xb4   :  { %p5058_p13 = scmp.ne.s32.totalorder %s125_s22, %s5057_s21  ;;  %p5063_p1 = scmp.lt.s32.totalorder %s5057_s21, %s5057_s21 }
  0xb6   :  { %p5064_p2 = por %p5063_p1, %p5062_p0 }
  0xb8   :  { %p5065_p3 = pnand %p5064_p2, %p5058_p13 }
  0xba   :  { %5068 = shalt.err (!%p5065_p3)
}
  0xbb   :  { %127 = dma.hbm_to_vmem [thread:$0]  %s5556_s8, 64, %s125_s22, [#allocation16]  }
  0xbc   :  { %s5190_s27 = smov [#allocation20]   ;;  %s5191_s9 = smov [#allocation23]  }
  0xbd   :  { %s146_s25 = sshll.u32 %s5190_s27, 4  ;;  %s168_s17 = sshll.u32 %s5191_s9, 4  ;;  %s147_s25 = int_to_ptr.vmem [resolvable:$true] %s146_s25  ;;  %s169_s17 = int_to_ptr.vmem [resolvable:$true] %s168_s17 }
  0xbe   :  { %s5069_s29 = scalar_lea.hbm %s5558_s10, 64 }
  0xbf   :  { %p5070_p4 = scmp.ne.s32.totalorder %s5558_s10, %s5069_s29  ;;  %p5073_p5 = scmp.lt.u32.totalorder %s5069_s29, %s5558_s10 }
  0xc1   :  { %p5075_p6 = pnand %p5073_p5, %p5070_p4 }
  0xc3   :  { %5078 = shalt.err (!%p5075_p6)
}
  0xc4   :  { %s5079_s8 = scalar_lea.vmem %s147_s25, 64  ;;  %p5084_p8 = scmp.lt.s32.totalorder %s147_s25, %s147_s25 }
  0xc5   :  { %p5080_p7 = scmp.ne.s32.totalorder %s147_s25, %s5079_s8  ;;  %p5085_p9 = scmp.lt.s32.totalorder %s5079_s8, %s5079_s8 }
  0xc7   :  { %p5086_p10 = por %p5085_p9, %p5084_p8 }
  0xc9   :  { %p5087_p11 = pnand %p5086_p10, %p5080_p7 }
  0xcb   :  { %5090 = shalt.err (!%p5087_p11)
}
  0xcc   :  { %149 = dma.hbm_to_vmem [thread:$0]  %s5558_s10, 64, %s147_s25, [#allocation19]  }
  0xcd   :  { %s5091_s1 = scalar_lea.hbm %s5560_s12, 64 }
  0xce   :  { %p5092_p12 = scmp.ne.s32.totalorder %s5560_s12, %s5091_s1  ;;  %p5095_p13 = scmp.lt.u32.totalorder %s5091_s1, %s5560_s12 }
  0xd0   :  { %p5097_p0 = pnand %p5095_p13, %p5092_p12 }
  0xd2   :  { %5100 = shalt.err (!%p5097_p0)
}
  0xd3   :  { %s5101_s16 = scalar_lea.vmem %s169_s17, 64  ;;  %p5106_p2 = scmp.lt.s32.totalorder %s169_s17, %s169_s17 }
  0xd4   :  { %p5102_p1 = scmp.ne.s32.totalorder %s169_s17, %s5101_s16  ;;  %p5107_p3 = scmp.lt.s32.totalorder %s5101_s16, %s5101_s16 }
  0xd6   :  { %p5108_p4 = por %p5107_p3, %p5106_p2 }
  0xd8   :  { %p5109_p5 = pnand %p5108_p4, %p5102_p1 }
  0xda   :  { %5112 = shalt.err (!%p5109_p5)
}
  0xdb   :  { %171 = dma.hbm_to_vmem [thread:$0]  %s5560_s12, 64, %s169_s17, [#allocation22]  }
  0xdc   :  { %s5192_s21 = smov [#allocation24]   ;;  %s5113_s25 = scalar_lea.hbm %s5561_s13, 64 }
  0xdd   :  { %s178_s6 = sshll.u32 %s5192_s21, 4  ;;  %p5114_p6 = scmp.ne.s32.totalorder %s5561_s13, %s5113_s25  ;;  %s179_s6 = int_to_ptr.vmem [resolvable:$true] %s178_s6 }
  0xde   :  { %p5117_p7 = scmp.lt.u32.totalorder %s5113_s25, %s5561_s13 }
  0xe0   :  { %p5119_p8 = pnand %p5117_p7, %p5114_p6 }
  0xe2   :  { %5122 = shalt.err (!%p5119_p8)
}
  0xe3   :  { %s5123_s0 = scalar_lea.vmem %s179_s6, 64  ;;  %p5128_p10 = scmp.lt.s32.totalorder %s179_s6, %s179_s6 }
  0xe4   :  { %p5124_p9 = scmp.ne.s32.totalorder %s179_s6, %s5123_s0  ;;  %p5129_p11 = scmp.lt.s32.totalorder %s5123_s0, %s5123_s0 }
  0xe6   :  { %p5130_p12 = por %p5129_p11, %p5128_p10 }
  0xe8   :  { %p5131_p13 = pnand %p5130_p12, %p5124_p9 }
  0xea   :  { %5134 = shalt.err (!%p5131_p13)
}
  0xeb   :  { %181 = dma.hbm_to_vmem [thread:$0]  %s5561_s13, 64, %s179_s6, [#allocation25]  }
  0xec   :  { %5157 = dma.done.wait [#allocation4], 16  }
  0xed   :  { %5158 = vsyncadd [#allocation4], 4294967280 }
  0xee   :  { %5159 = dma.done.wait [#allocation7], 544  }
  0xef   :  { %5160 = vsyncadd [#allocation7], 4294966752 }
  0xf0   :  { %5161 = dma.done.wait [#allocation10], 528  }
  0xf1   :  { %5162 = vsyncadd [#allocation10], 4294966768 }
  0xf2   :  { %5163 = dma.done.wait [#allocation13], 3392  }
  0xf3   :  { %5164 = vsyncadd [#allocation13], 4294963904 }
  0xf4   :  { %5165 = dma.done.wait [#allocation16], 16448  }
  0xf5   :  { %5166 = vsyncadd [#allocation16], 4294950848 }
  0xf6   :  { %5167 = dma.done.wait [#allocation19], 16448  }
  0xf7   :  { %5168 = vsyncadd [#allocation19], 4294950848 }
  0xf8   :  { %5169 = dma.done.wait [#allocation22], 16448  }
  0xf9   :  { %5170 = vsyncadd [#allocation22], 4294950848 }
  0xfa   :  { %5171 = dma.done.wait [#allocation25], 64  }
  0xfb   :  { %5172 = vsyncadd [#allocation25], 4294967232  ;;  %v5193_v0 = vmov 0.0   ;;  %vm5194_vm0 = vmmov 0   ;;  %v4199_v1 = vld [vmem:[#allocation8] sm:$0xff]   ;;  %v4201_v3 = vld [vmem:[#allocation8 + $0x8] sm:$0xff]  }
  0xfc   :  { %4116 = vmatprep.subr.bf16.mxu0 %v5193_v0  ;;  %4128 = vmatprep.subr.bf16.mxu1 %v5193_v0  ;;  %v4200_v2 = vld [vmem:[#allocation9] sm:$0xff]   ;;  %v4202_v4 = vld [vmem:[#allocation9 + $0x8] sm:$0xff]   ;;  %v4203_v5 = vld [vmem:[#allocation8 + $0x10] sm:$0xff]   ;;  %s5195_s13 = smov 96   ;;  %vm260_vm1 = vcmask 523264   ;;  %vm581_vm2 = vcmask 1041408  }
  0xfd   :  { %4124 = vmatprep.mubr.msk.bf16.mxu0 %vm5194_vm0, %v5193_v0  ;;  %4136 = vmatprep.mubr.msk.bf16.mxu1 %vm5194_vm0, %v5193_v0  ;;  %v4204_v6 = vld [vmem:[#allocation9 + $0x10] sm:$0xff]   ;;  %v391_v7 = vld [vmem:[#allocation6] sm:$0x3]  ;;  %v227_v12 = vld [vmem:[#allocation3] sm:$0x1]  ;;  %v5196_v43 = vmov 0  }
  0xfe   :  { %4117 = vmatpush3.bf16.msra.mxu0 %v4199_v1  ;;  %4129 = vmatpush3.bf16.msra.mxu1 %v4200_v2  ;;  %v4205_v8 = vld [vmem:[#allocation8 + $0x18] sm:$0xff]   ;;  %v4207_v13 = vld [vmem:[#allocation12] ss:$16 sps:$4 sm:$0xff]   ;;  %v424_v36 = vld [vmem:[#allocation12 + $0xc8] sm:$0x33]  ;;  %vm396_vm7 = vcmask 785408  }
  0xff   :  { %4118 = vmatprep.subr.bf16.mxu0 %v5193_v0  ;;  %4130 = vmatprep.subr.bf16.mxu1 %v5193_v0  ;;  %v4206_v9 = vld [vmem:[#allocation9 + $0x18] sm:$0xff]   ;;  %v4213_v17 = vld [vmem:[#allocation12 + $0x20] ss:$16 sps:$4 sm:$0xff]   ;;  %v3717_v38 = vcombine.high %v424_v36, %v424_v36  ;;  %v3716_v40 = vcombine.low %v424_v36, %v424_v36  ;;  %v3689_v49 = vld [vmem:[#allocation11] ss:$0 sm:$0xff]  ;;  %vm577_vm8 = vcmask 818176  }
 0x100   :  { %393 = vrot.lane.b32.xlu0 %v391_v7, %s5195_s13  ;;  %v4209_v10 = vld [vmem:[#allocation12 + $0x4] ss:$16 sps:$4 sm:$0xff]   ;;  %v4212_v11 = vld [vmem:[#allocation12 + $0xc] ss:$16 sps:$4 sm:$0xff]   ;;  %v4210_v14 = vld [vmem:[#allocation12 + $0x8] ss:$16 sps:$4 sm:$0xff]  }
 0x101   :  { %v4215_v15 = vld [vmem:[#allocation12 + $0x24] ss:$16 sps:$4 sm:$0xff]   ;;  %v4218_v16 = vld [vmem:[#allocation12 + $0x2c] ss:$16 sps:$4 sm:$0xff]   ;;  %v4216_v18 = vld [vmem:[#allocation12 + $0x28] ss:$16 sps:$4 sm:$0xff]  }
 0x102   :  { %4119 = vmatpush3.bf16.msra.mxu0 %v4201_v3  ;;  %4131 = vmatpush3.bf16.msra.mxu1 %v4202_v4  ;;  %v4221_v19 = vld [vmem:[#allocation12 + $0x44] ss:$16 sps:$4 sm:$0xff]   ;;  %v4224_v20 = vld [vmem:[#allocation12 + $0x4c] ss:$16 sps:$4 sm:$0xff]   ;;  %v4219_v21 = vld [vmem:[#allocation12 + $0x40] ss:$16 sps:$4 sm:$0xff]  }
 0x103   :  { %4120 = vmatprep.subr.bf16.mxu0 %v5193_v0  ;;  %4132 = vmatprep.subr.bf16.mxu1 %v5193_v0  ;;  %v4222_v22 = vld [vmem:[#allocation12 + $0x48] ss:$16 sps:$4 sm:$0xff]   ;;  %v4227_v23 = vld [vmem:[#allocation12 + $0x64] ss:$16 sps:$4 sm:$0xff]   ;;  %v4230_v24 = vld [vmem:[#allocation12 + $0x6c] ss:$16 sps:$4 sm:$0xff]  }
 0x104   :  { %v4225_v25 = vld [vmem:[#allocation12 + $0x60] ss:$16 sps:$4 sm:$0xff]   ;;  %v4228_v26 = vld [vmem:[#allocation12 + $0x68] ss:$16 sps:$4 sm:$0xff]   ;;  %v4233_v27 = vld [vmem:[#allocation12 + $0x84] ss:$16 sps:$4 sm:$0xff]  }
 0x105   :  { %v4236_v28 = vld [vmem:[#allocation12 + $0x8c] ss:$16 sps:$4 sm:$0xff]   ;;  %v4231_v29 = vld [vmem:[#allocation12 + $0x80] ss:$16 sps:$4 sm:$0xff]   ;;  %v4234_v30 = vld [vmem:[#allocation12 + $0x88] ss:$16 sps:$4 sm:$0xff]  }
 0x106   :  { %4121 = vmatpush3.bf16.msra.mxu0 %v4203_v5  ;;  %4133 = vmatpush3.bf16.msra.mxu1 %v4204_v6  ;;  %v4239_v31 = vld [vmem:[#allocation12 + $0xa4] ss:$16 sps:$4 sm:$0xff]   ;;  %v4242_v32 = vld [vmem:[#allocation12 + $0xac] ss:$16 sps:$4 sm:$0xff]   ;;  %v4237_v33 = vld [vmem:[#allocation12 + $0xa0] ss:$16 sps:$4 sm:$0xff]  }
 0x107   :  { %4122 = vmatprep.subr.bf16.mxu0 %v5193_v0  ;;  %4134 = vmatprep.subr.bf16.mxu1 %v5193_v0  ;;  %v4240_v34 = vld [vmem:[#allocation12 + $0xa8] ss:$16 sps:$4 sm:$0xff]   ;;  %v423_v35 = vld [vmem:[#allocation12 + $0xc0] sm:$0x33]  ;;  %v589_v42 = vsel %vm581_vm2, %v3716_v40, 0  ;;  %s5197_s5 = smov [#allocation26]  }
 0x108   :  { %v3715_v37 = vcombine.high %v423_v35, %v423_v35  ;;  %v3714_v39 = vcombine.low %v423_v35, %v423_v35  ;;  %v4249_v44 = vld [vmem:[#allocation15 + $0x4] ss:$16 sps:$4 sm:$0xff]   ;;  %v4252_v45 = vld [vmem:[#allocation15 + $0xc] ss:$16 sps:$4 sm:$0xff]   ;;  %v4247_v61 = vld [vmem:[#allocation15] ss:$16 sps:$4 sm:$0xff]  }
 0x109   :  { %v4250_v62 = vld [vmem:[#allocation15 + $0x8] ss:$16 sps:$4 sm:$0xff]   ;;  %v4255_v0 = vld [vmem:[#allocation15 + $0x24] ss:$16 sps:$4 sm:$0xff]   ;;  %v4258_v1 = vld [vmem:[#allocation15 + $0x2c] ss:$16 sps:$4 sm:$0xff]  }
 0x10a   :  { %4123 = vmatpush3.bf16.msra.mxu0 %v4205_v8  ;;  %4135 = vmatpush3.bf16.msra.mxu1 %v4206_v9  ;;  %v583_v41 = vsel %vm581_vm2, %v3714_v39, 0  ;;  %v4253_v2 = vld [vmem:[#allocation15 + $0x20] ss:$16 sps:$4 sm:$0xff]   ;;  %v4256_v3 = vld [vmem:[#allocation15 + $0x28] ss:$16 sps:$4 sm:$0xff]   ;;  %s3663_s8 = sshll.u32 %s5197_s5, 4  ;;  %s3664_s8 = int_to_ptr.vmem [resolvable:$true] %s3663_s8 }
 0x10b   :  { %594 = vmatprep.subr.bf16.mxu0 %v4209_v10  ;;  %635 = vmatprep.subr.bf16.mxu1 %v4212_v11  ;;  %v4261_v4 = vld [vmem:[#allocation15 + $0x44] ss:$16 sps:$4 sm:$0xff]   ;;  %v4264_v5 = vld [vmem:[#allocation15 + $0x4c] ss:$16 sps:$4 sm:$0xff]   ;;  %v4259_v6 = vld [vmem:[#allocation15 + $0x40] ss:$16 sps:$4 sm:$0xff]   ;;  %p5140_p1 = scmp.lt.s32.totalorder %s3664_s8, %s3664_s8 }
 0x10c   :  { %v4262_v7 = vld [vmem:[#allocation15 + $0x48] ss:$16 sps:$4 sm:$0xff]   ;;  %v4267_v8 = vld [vmem:[#allocation15 + $0x64] ss:$16 sps:$4 sm:$0xff]   ;;  %v4270_v9 = vld [vmem:[#allocation15 + $0x6c] ss:$16 sps:$4 sm:$0xff]  }
 0x10d   :  { %4125 = vmatmul.mubr.msk.bf16.vlgmr.msra.gmra.mrb[0].mxu0 %vm260_vm1, %v227_v12  ;;  %4137 = vmatmul.mubr.msk.bf16.vlgmr.msra.gmra.mrb[0].mxu1 %vm260_vm1, %v227_v12  ;;  %v4265_v10 = vld [vmem:[#allocation15 + $0x60] ss:$16 sps:$4 sm:$0xff]   ;;  %v4268_v11 = vld [vmem:[#allocation15 + $0x68] ss:$16 sps:$4 sm:$0xff]   ;;  %v4273_v12 = vld [vmem:[#allocation15 + $0x84] ss:$16 sps:$4 sm:$0xff]  }
 0x10e   :  { %595 = vmatpush1.bf16.msra.mxu0 %v4207_v13  ;;  %636 = vmatpush1.bf16.msra.mxu1 %v4210_v14  ;;  %v4276_v13 = vld [vmem:[#allocation15 + $0x8c] ss:$16 sps:$4 sm:$0xff]   ;;  %v4271_v14 = vld [vmem:[#allocation15 + $0x80] ss:$16 sps:$4 sm:$0xff]   ;;  %v4304_v35 = vld [vmem:[#allocation15 + $0x128] ss:$16 sps:$4 sm:$0xff]  }
 0x10f   :  { %596 = vmatprep.subr.bf16.mxu0 %v4215_v15  ;;  %637 = vmatprep.subr.bf16.mxu1 %v4218_v16  ;;  %v4274_v15 = vld [vmem:[#allocation15 + $0x88] ss:$16 sps:$4 sm:$0xff]   ;;  %v4279_v16 = vld [vmem:[#allocation15 + $0xa4] ss:$16 sps:$4 sm:$0xff]  }
 0x110   :  { %626 = vmatprep.mubr.bf16.mxu0 %v5196_v43  ;;  %667 = vmatprep.mubr.bf16.mxu1 %v5196_v43  ;;  %v4309_v36 = vld [vmem:[#allocation15 + $0x144] ss:$16 sps:$4 sm:$0xff]   ;;  %v4310_v39 = vld [vmem:[#allocation15 + $0x148] ss:$16 sps:$4 sm:$0xff]  }
 0x111   :  { %v4315_v40 = vld [vmem:[#allocation15 + $0x164] ss:$16 sps:$4 sm:$0xff]   ;;  %v4316_v43 = vld [vmem:[#allocation15 + $0x168] ss:$16 sps:$4 sm:$0xff]  }
 0x112   :  { %597 = vmatpush1.bf16.msra.mxu0 %v4213_v17  ;;  %638 = vmatpush1.bf16.msra.mxu1 %v4216_v18  ;;  %v4282_v17 = vld [vmem:[#allocation15 + $0xac] ss:$16 sps:$4 sm:$0xff]   ;;  %v4277_v18 = vld [vmem:[#allocation15 + $0xa0] ss:$16 sps:$4 sm:$0xff]  }
 0x113   :  { %598 = vmatprep.subr.bf16.mxu0 %v4221_v19  ;;  %639 = vmatprep.subr.bf16.mxu1 %v4224_v20  ;;  %v4280_v19 = vld [vmem:[#allocation15 + $0xa8] ss:$16 sps:$4 sm:$0xff]   ;;  %v4285_v20 = vld [vmem:[#allocation15 + $0xc4] ss:$16 sps:$4 sm:$0xff]  }
 0x116   :  { %599 = vmatpush1.bf16.msra.mxu0 %v4219_v21  ;;  %640 = vmatpush1.bf16.msra.mxu1 %v4222_v22  ;;  %v4288_v21 = vld [vmem:[#allocation15 + $0xcc] ss:$16 sps:$4 sm:$0xff]   ;;  %v4283_v22 = vld [vmem:[#allocation15 + $0xc0] ss:$16 sps:$4 sm:$0xff]  }
 0x117   :  { %600 = vmatprep.subr.bf16.mxu0 %v4227_v23  ;;  %641 = vmatprep.subr.bf16.mxu1 %v4230_v24  ;;  %v4286_v23 = vld [vmem:[#allocation15 + $0xc8] ss:$16 sps:$4 sm:$0xff]   ;;  %v4291_v24 = vld [vmem:[#allocation15 + $0xe4] ss:$16 sps:$4 sm:$0xff]  }
 0x11a   :  { %601 = vmatpush1.bf16.msra.mxu0 %v4225_v25  ;;  %642 = vmatpush1.bf16.msra.mxu1 %v4228_v26  ;;  %v4294_v25 = vld [vmem:[#allocation15 + $0xec] ss:$16 sps:$4 sm:$0xff]   ;;  %v4289_v26 = vld [vmem:[#allocation15 + $0xe0] ss:$16 sps:$4 sm:$0xff]  }
 0x11b   :  { %602 = vmatprep.subr.bf16.mxu0 %v4233_v27  ;;  %643 = vmatprep.subr.bf16.mxu1 %v4236_v28  ;;  %v4292_v27 = vld [vmem:[#allocation15 + $0xe8] ss:$16 sps:$4 sm:$0xff]   ;;  %v4297_v28 = vld [vmem:[#allocation15 + $0x104] ss:$16 sps:$4 sm:$0xff]  }
 0x11e   :  { %603 = vmatpush1.bf16.msra.mxu0 %v4231_v29  ;;  %644 = vmatpush1.bf16.msra.mxu1 %v4234_v30  ;;  %v4300_v29 = vld [vmem:[#allocation15 + $0x10c] ss:$16 sps:$4 sm:$0xff]   ;;  %v4295_v30 = vld [vmem:[#allocation15 + $0x100] ss:$16 sps:$4 sm:$0xff]  }
 0x11f   :  { %604 = vmatprep.subr.bf16.mxu0 %v4239_v31  ;;  %645 = vmatprep.subr.bf16.mxu1 %v4242_v32  ;;  %v4298_v31 = vld [vmem:[#allocation15 + $0x108] ss:$16 sps:$4 sm:$0xff]   ;;  %v4303_v32 = vld [vmem:[#allocation15 + $0x124] ss:$16 sps:$4 sm:$0xff]  }
 0x122   :  { %605 = vmatpush1.bf16.msra.mxu0 %v4237_v33  ;;  %646 = vmatpush1.bf16.msra.mxu1 %v4240_v34  ;;  %v4306_v33 = vld [vmem:[#allocation15 + $0x12c] ss:$16 sps:$4 sm:$0xff]   ;;  %v4301_v34 = vld [vmem:[#allocation15 + $0x120] ss:$16 sps:$4 sm:$0xff]  }
 0x123   :  { %3718 = vmatprep.subr.msk.bf16.mxu0 %vm581_vm2, %v3715_v37  ;;  %3720 = vmatprep.subr.msk.bf16.mxu1 %vm581_vm2, %v3717_v38  ;;  %v4312_v37 = vld [vmem:[#allocation15 + $0x14c] ss:$16 sps:$4 sm:$0xff]   ;;  %v4307_v38 = vld [vmem:[#allocation15 + $0x140] ss:$16 sps:$4 sm:$0xff]  }
 0x126   :  { %607 = vmatpush1.bf16.msra.mxu0 %v583_v41  ;;  %648 = vmatpush1.bf16.msra.mxu1 %v589_v42  ;;  %v4318_v41 = vld [vmem:[#allocation15 + $0x16c] ss:$16 sps:$4 sm:$0xff]   ;;  %v4313_v42 = vld [vmem:[#allocation15 + $0x160] ss:$16 sps:$4 sm:$0xff]  }
 0x127   :  { %1482 = vmatprep.subr.bf16.mxu0 %v4249_v44  ;;  %1564 = vmatprep.subr.bf16.mxu1 %v4252_v45  ;;  %v4321_v44 = vld [vmem:[#allocation15 + $0x184] ss:$16 sps:$4 sm:$0xff]   ;;  %v4324_v45 = vld [vmem:[#allocation15 + $0x18c] ss:$16 sps:$4 sm:$0xff]  }
 0x172   :  { %v394_v57 = vpop.permute.xlu0 %393 }
 0x1e0   :  { %v298_v46 = vpop.f32.mrb[0].mxu0  ;;  %v370_v47 = vpop.f32.mrb[0].mxu1 }
 0x1e1   :  { %v4126_v48 = vpop.f32.mrb[1].mxu0  ;;  %vm376_vm3 = vcmp.gt.f32.partialorder %v298_v46, %v370_v47  ;;  %vm377_vm4 = vcmp.ne.f32.partialorder %v370_v47, %v370_v47  ;;  %v4138_v50 = vpop.f32.mrb[1].mxu1 }
 0x1e2   :  { %v301_v51 = vpop.f32.mrb[2].mxu0  ;;  %vm378_vm5 = vmor %vm376_vm3, %vm377_vm4  ;;  %v373_v52 = vpop.f32.mrb[2].mxu1  ;;  %v4327_v48 = vld [vmem:[#allocation15 + $0x1a4] ss:$16 sps:$4 sm:$0xff]   ;;  %v4325_v50 = vld [vmem:[#allocation15 + $0x1a0] ss:$16 sps:$4 sm:$0xff]  }
 0x1e3   :  { %v4127_v53 = vpop.f32.mrb[3].mxu0  ;;  %v379_v54 = vsel %vm378_vm5, %v298_v46, %v370_v47  ;;  %v4139_v55 = vpop.f32.mrb[3].mxu1  ;;  %v4319_v46 = vld [vmem:[#allocation15 + $0x180] ss:$16 sps:$4 sm:$0xff]   ;;  %v4322_v47 = vld [vmem:[#allocation15 + $0x188] ss:$16 sps:$4 sm:$0xff]  }
 0x1e4   :  { %v387_v56 = vadd.f32 %v3689_v49, %v379_v54  ;;  %v4330_v49 = vld [vmem:[#allocation15 + $0x1ac] ss:$16 sps:$4 sm:$0xff]   ;;  %v4328_v51 = vld [vmem:[#allocation15 + $0x1a8] ss:$16 sps:$4 sm:$0xff]   ;;  %v4333_v52 = vld [vmem:[#allocation15 + $0x1c4] ss:$16 sps:$4 sm:$0xff]  }
 0x1e5   :  { %v4336_v53 = vld [vmem:[#allocation15 + $0x1cc] ss:$16 sps:$4 sm:$0xff]   ;;  %v4331_v54 = vld [vmem:[#allocation15 + $0x1c0] ss:$16 sps:$4 sm:$0xff]   ;;  %v4334_v55 = vld [vmem:[#allocation15 + $0x1c8] ss:$16 sps:$4 sm:$0xff]  }
 0x1e6   :  { %vm388_vm6 = vcmp.gt.f32.partialorder %v387_v56, 0.0 }
 0x1e7   :  { %v389_v58 = vsel %vm388_vm6, %v387_v56, 0.0  ;;  %v4339_v56 = vld [vmem:[#allocation15 + $0x1e4] ss:$16 sps:$4 sm:$0xff]  }
 0x1e8   :  { %v390_v59 = vmin.f32 %v389_v58, 3.4028235e+38  ;;  %v4337_v58 = vld [vmem:[#allocation15 + $0x1e0] ss:$16 sps:$4 sm:$0xff]  }
 0x1ea   :  { %v397_v60 = vsel %vm396_vm7, %v390_v59, %v394_v57  ;;  %v4342_v57 = vld [vmem:[#allocation15 + $0x1ec] ss:$16 sps:$4 sm:$0xff]   ;;  %v4340_v59 = vld [vmem:[#allocation15 + $0x1e8] ss:$16 sps:$4 sm:$0xff]  }
 0x1eb   :  { %v398_v63 = vpack.c.bf16 %v397_v60, %v397_v60  ;;  %v4345_v60 = vld [vmem:[#allocation15 + $0x204] ss:$16 sps:$4 sm:$0xff]  }
 0x1ed   :  { %3719 = vmatmul.mubr.msk.bf16.vlgmr.msra.gmra.mrb[4].mxu0 %vm577_vm8, %v398_v63  ;;  %3721 = vmatmul.mubr.msk.bf16.vlgmr.msra.gmra.mrb[4].mxu1 %vm577_vm8, %v398_v63 }
 0x1ee   :  { %1483 = vmatpush1.bf16.msra.mxu0 %v4247_v61  ;;  %1565 = vmatpush1.bf16.msra.mxu1 %v4250_v62  ;;  %v4348_v61 = vld [vmem:[#allocation15 + $0x20c] ss:$16 sps:$4 sm:$0xff]   ;;  %v427_v62 = vlaneseq }
 0x1ef   :  { %1484 = vmatprep.subr.bf16.mxu0 %v4255_v0  ;;  %1566 = vmatprep.subr.bf16.mxu1 %v4258_v1  ;;  %v5473_v1 = vld [vmem:[#allocation14] sm:$0xf] }
 0x1f0   :  { %v5468_v63 = vshrl.u32 %v427_v62, 7  ;;  %v4402_v62 = vld [vmem:[#allocation15 + $0x32c] ss:$16 sps:$4 sm:$0xff]  }
 0x1f2   :  { %1485 = vmatpush1.bf16.msra.mxu0 %v4253_v2  ;;  %1567 = vmatpush1.bf16.msra.mxu1 %v4256_v3  ;;  %v5471_v0 = vsub.s32 0, %v5468_v63  ;;  %v5476_v2 = vsub.s32 1, %v5468_v63  ;;  %v5479_v3 = vsub.s32 3, %v5468_v63 }
 0x1f3   :  { %1486 = vmatprep.subr.bf16.mxu0 %v4261_v4  ;;  %1568 = vmatprep.subr.bf16.mxu1 %v4264_v5 }
 0x1f4   :  { %v430_v4 = vrot.slane %v5473_v1, %v5471_v0  ;;  %v434_v5 = vrot.slane %v5473_v1, %v5476_v2 }
 0x1f6   :  { %1487 = vmatpush1.bf16.msra.mxu0 %v4259_v6  ;;  %1569 = vmatpush1.bf16.msra.mxu1 %v4262_v7  ;;  %v442_v6 = vrot.slane %v5473_v1, %v5479_v3 }
 0x1f7   :  { %1488 = vmatprep.subr.bf16.mxu0 %v4267_v8  ;;  %1570 = vmatprep.subr.bf16.mxu1 %v4270_v9 }
 0x1fa   :  { %1489 = vmatpush1.bf16.msra.mxu0 %v4265_v10  ;;  %1571 = vmatpush1.bf16.msra.mxu1 %v4268_v11 }
 0x1fb   :  { %1490 = vmatprep.subr.bf16.mxu0 %v4273_v12  ;;  %1572 = vmatprep.subr.bf16.mxu1 %v4276_v13 }
 0x1fe   :  { %1491 = vmatpush1.bf16.msra.mxu0 %v4271_v14  ;;  %1573 = vmatpush1.bf16.msra.mxu1 %v4274_v15 }
 0x1ff   :  { %1492 = vmatprep.subr.bf16.mxu0 %v4279_v16  ;;  %1574 = vmatprep.subr.bf16.mxu1 %v4282_v17 }
 0x202   :  { %1493 = vmatpush1.bf16.msra.mxu0 %v4277_v18  ;;  %1575 = vmatpush1.bf16.msra.mxu1 %v4280_v19 }
 0x203   :  { %1494 = vmatprep.subr.bf16.mxu0 %v4285_v20  ;;  %1576 = vmatprep.subr.bf16.mxu1 %v4288_v21 }
 0x206   :  { %1495 = vmatpush1.bf16.msra.mxu0 %v4283_v22  ;;  %1577 = vmatpush1.bf16.msra.mxu1 %v4286_v23 }
 0x207   :  { %1496 = vmatprep.subr.bf16.mxu0 %v4291_v24  ;;  %1578 = vmatprep.subr.bf16.mxu1 %v4294_v25  ;;  %v4343_v25 = vld [vmem:[#allocation15 + $0x200] ss:$16 sps:$4 sm:$0xff]  }
 0x20a   :  { %1497 = vmatpush1.bf16.msra.mxu0 %v4289_v26  ;;  %1579 = vmatpush1.bf16.msra.mxu1 %v4292_v27  ;;  %v4346_v26 = vld [vmem:[#allocation15 + $0x208] ss:$16 sps:$4 sm:$0xff]  }
 0x20b   :  { %1498 = vmatprep.subr.bf16.mxu0 %v4297_v28  ;;  %1580 = vmatprep.subr.bf16.mxu1 %v4300_v29  ;;  %v4351_v28 = vld [vmem:[#allocation15 + $0x224] ss:$16 sps:$4 sm:$0xff]   ;;  %v4354_v29 = vld [vmem:[#allocation15 + $0x22c] ss:$16 sps:$4 sm:$0xff]  }
 0x20e   :  { %1499 = vmatpush1.bf16.msra.mxu0 %v4295_v30  ;;  %1581 = vmatpush1.bf16.msra.mxu1 %v4298_v31  ;;  %v4349_v31 = vld [vmem:[#allocation15 + $0x220] ss:$16 sps:$4 sm:$0xff]  }
 0x20f   :  { %1500 = vmatprep.subr.bf16.mxu0 %v4303_v32  ;;  %1582 = vmatprep.subr.bf16.mxu1 %v4306_v33  ;;  %v4352_v32 = vld [vmem:[#allocation15 + $0x228] ss:$16 sps:$4 sm:$0xff]   ;;  %v4357_v33 = vld [vmem:[#allocation15 + $0x244] ss:$16 sps:$4 sm:$0xff]  }
 0x212   :  { %1501 = vmatpush1.bf16.msra.mxu0 %v4301_v34  ;;  %1583 = vmatpush1.bf16.msra.mxu1 %v4304_v35  ;;  %v4360_v34 = vld [vmem:[#allocation15 + $0x24c] ss:$16 sps:$4 sm:$0xff]   ;;  %v4355_v35 = vld [vmem:[#allocation15 + $0x240] ss:$16 sps:$4 sm:$0xff]  }
 0x213   :  { %1502 = vmatprep.subr.bf16.mxu0 %v4309_v36  ;;  %1584 = vmatprep.subr.bf16.mxu1 %v4312_v37  ;;  %v4358_v36 = vld [vmem:[#allocation15 + $0x248] ss:$16 sps:$4 sm:$0xff]   ;;  %v4363_v37 = vld [vmem:[#allocation15 + $0x264] ss:$16 sps:$4 sm:$0xff]  }
 0x216   :  { %1503 = vmatpush1.bf16.msra.mxu0 %v4307_v38  ;;  %1585 = vmatpush1.bf16.msra.mxu1 %v4310_v39  ;;  %v4366_v38 = vld [vmem:[#allocation15 + $0x26c] ss:$16 sps:$4 sm:$0xff]   ;;  %v4361_v39 = vld [vmem:[#allocation15 + $0x260] ss:$16 sps:$4 sm:$0xff]  }
 0x217   :  { %1504 = vmatprep.subr.bf16.mxu0 %v4315_v40  ;;  %1586 = vmatprep.subr.bf16.mxu1 %v4318_v41  ;;  %v4364_v40 = vld [vmem:[#allocation15 + $0x268] ss:$16 sps:$4 sm:$0xff]   ;;  %v4369_v41 = vld [vmem:[#allocation15 + $0x284] ss:$16 sps:$4 sm:$0xff]  }
 0x21a   :  { %1505 = vmatpush1.bf16.msra.mxu0 %v4313_v42  ;;  %1587 = vmatpush1.bf16.msra.mxu1 %v4316_v43  ;;  %v4372_v42 = vld [vmem:[#allocation15 + $0x28c] ss:$16 sps:$4 sm:$0xff]   ;;  %v4367_v43 = vld [vmem:[#allocation15 + $0x280] ss:$16 sps:$4 sm:$0xff]  }
 0x21b   :  { %1506 = vmatprep.subr.bf16.mxu0 %v4321_v44  ;;  %1588 = vmatprep.subr.bf16.mxu1 %v4324_v45  ;;  %v4370_v44 = vld [vmem:[#allocation15 + $0x288] ss:$16 sps:$4 sm:$0xff]   ;;  %v4375_v45 = vld [vmem:[#allocation15 + $0x2a4] ss:$16 sps:$4 sm:$0xff]  }
 0x21e   :  { %1507 = vmatpush1.bf16.msra.mxu0 %v4319_v46  ;;  %1589 = vmatpush1.bf16.msra.mxu1 %v4322_v47  ;;  %v4378_v46 = vld [vmem:[#allocation15 + $0x2ac] ss:$16 sps:$4 sm:$0xff]   ;;  %v4373_v47 = vld [vmem:[#allocation15 + $0x2a0] ss:$16 sps:$4 sm:$0xff]  }
 0x21f   :  { %1508 = vmatprep.subr.bf16.mxu0 %v4327_v48  ;;  %1590 = vmatprep.subr.bf16.mxu1 %v4330_v49  ;;  %v4376_v48 = vld [vmem:[#allocation15 + $0x2a8] ss:$16 sps:$4 sm:$0xff]   ;;  %v4381_v49 = vld [vmem:[#allocation15 + $0x2c4] ss:$16 sps:$4 sm:$0xff]  }
 0x222   :  { %1509 = vmatpush1.bf16.msra.mxu0 %v4325_v50  ;;  %1591 = vmatpush1.bf16.msra.mxu1 %v4328_v51  ;;  %v4384_v50 = vld [vmem:[#allocation15 + $0x2cc] ss:$16 sps:$4 sm:$0xff]   ;;  %v4379_v51 = vld [vmem:[#allocation15 + $0x2c0] ss:$16 sps:$4 sm:$0xff]  }
 0x223   :  { %1510 = vmatprep.subr.bf16.mxu0 %v4333_v52  ;;  %1592 = vmatprep.subr.bf16.mxu1 %v4336_v53  ;;  %v4382_v52 = vld [vmem:[#allocation15 + $0x2c8] ss:$16 sps:$4 sm:$0xff]   ;;  %v4387_v53 = vld [vmem:[#allocation15 + $0x2e4] ss:$16 sps:$4 sm:$0xff]  }
 0x226   :  { %1511 = vmatpush1.bf16.msra.mxu0 %v4331_v54  ;;  %1593 = vmatpush1.bf16.msra.mxu1 %v4334_v55  ;;  %v4390_v54 = vld [vmem:[#allocation15 + $0x2ec] ss:$16 sps:$4 sm:$0xff]   ;;  %v4385_v55 = vld [vmem:[#allocation15 + $0x2e0] ss:$16 sps:$4 sm:$0xff]  }
 0x227   :  { %1512 = vmatprep.subr.bf16.mxu0 %v4339_v56  ;;  %1594 = vmatprep.subr.bf16.mxu1 %v4342_v57  ;;  %v4388_v56 = vld [vmem:[#allocation15 + $0x2e8] ss:$16 sps:$4 sm:$0xff]   ;;  %v4393_v57 = vld [vmem:[#allocation15 + $0x304] ss:$16 sps:$4 sm:$0xff]  }
 0x22a   :  { %1513 = vmatpush1.bf16.msra.mxu0 %v4337_v58  ;;  %1595 = vmatpush1.bf16.msra.mxu1 %v4340_v59  ;;  %v4396_v58 = vld [vmem:[#allocation15 + $0x30c] ss:$16 sps:$4 sm:$0xff]   ;;  %v4391_v59 = vld [vmem:[#allocation15 + $0x300] ss:$16 sps:$4 sm:$0xff]  }
 0x22b   :  { %1523 = vmatprep.subr.bf16.mxu0 %v4345_v60  ;;  %1605 = vmatprep.subr.bf16.mxu1 %v4348_v61  ;;  %v4394_v60 = vld [vmem:[#allocation15 + $0x308] ss:$16 sps:$4 sm:$0xff]   ;;  %v4399_v61 = vld [vmem:[#allocation15 + $0x324] ss:$16 sps:$4 sm:$0xff]  }
 0x2c0   :  { %v628_v7 = vpop.f32.mrb[4].mxu0  ;;  %v5487_v8 = vpop.f32.mrb[4].mxu1 }
 0x2c1   :  { %v629_v9 = vadd.f32 %v628_v7, %v430_v4  ;;  %v630_v10 = vpop.f32.mrb[5].mxu0  ;;  %v671_v11 = vpop.f32.mrb[5].mxu1  ;;  %v4397_v4 = vld [vmem:[#allocation15 + $0x320] ss:$16 sps:$4 sm:$0xff]   ;;  %v4408_v7 = vld [vmem:[#allocation15 + $0x34c] ss:$16 sps:$4 sm:$0xff]  }
 0x2c2   :  { %v631_v12 = vadd.f32 %v630_v10, %v434_v5  ;;  %v672_v13 = vadd.f32 %v671_v11, %v442_v6  ;;  %v632_v14 = vpop.f32.mrb[6].mxu0  ;;  %v673_v15 = vpop.f32.mrb[6].mxu1  ;;  %v4400_v5 = vld [vmem:[#allocation15 + $0x328] ss:$16 sps:$4 sm:$0xff]   ;;  %v4405_v6 = vld [vmem:[#allocation15 + $0x344] ss:$16 sps:$4 sm:$0xff]  }
 0x2c3   :  { %vm676_vm9 = vcmp.gt.f32.partialorder %v629_v9, 0.0  ;;  %v633_v16 = vpop.f32.mrb[7].mxu0  ;;  %v674_v17 = vpop.f32.mrb[7].mxu1  ;;  %v4406_v10 = vld [vmem:[#allocation15 + $0x348] ss:$16 sps:$4 sm:$0xff]  }
 0x2c4   :  { %v680_v18 = vsel %vm676_vm9, %v629_v9, 0.0  ;;  %vm677_vm10 = vcmp.gt.f32.partialorder %v631_v12, 0.0  ;;  %vm679_vm11 = vcmp.gt.f32.partialorder %v672_v13, 0.0  ;;  %v4403_v9 = vld [vmem:[#allocation15 + $0x340] ss:$16 sps:$4 sm:$0xff]  }
 0x2c5   :  { %v684_v19 = vmin.f32 %v680_v18, 3.4028235e+38  ;;  %v681_v20 = vsel %vm677_vm10, %v631_v12, 0.0  ;;  %v683_v21 = vsel %vm679_vm11, %v672_v13, 0.0  ;;  %v4411_v11 = vld [vmem:[#allocation15 + $0x364] ss:$16 sps:$4 sm:$0xff]  }
 0x2c6   :  { %v685_v22 = vmin.f32 %v681_v20, 3.4028235e+38  ;;  %v687_v23 = vmin.f32 %v683_v21, 3.4028235e+38  ;;  %v4414_v12 = vld [vmem:[#allocation15 + $0x36c] ss:$16 sps:$4 sm:$0xff]  }
 0x2c7   :  { %v688_v27 = vpack.c.bf16 %v684_v19, %v684_v19  ;;  %v5490_v13 = vsub.s32 2, %v5468_v63  ;;  %v4409_v14 = vld [vmem:[#allocation15 + $0x360] ss:$16 sps:$4 sm:$0xff]   ;;  %v4412_v15 = vld [vmem:[#allocation15 + $0x368] ss:$16 sps:$4 sm:$0xff]  }
 0x2c8   :  { %v689_v24 = vpack.c.bf16 %v685_v22, %v685_v22  ;;  %v691_v30 = vpack.c.bf16 %v687_v23, %v687_v23  ;;  %v4417_v16 = vld [vmem:[#allocation15 + $0x384] ss:$16 sps:$4 sm:$0xff]   ;;  %v4420_v17 = vld [vmem:[#allocation15 + $0x38c] ss:$16 sps:$4 sm:$0xff]   ;;  %v4415_v19 = vld [vmem:[#allocation15 + $0x380] ss:$16 sps:$4 sm:$0xff]  }
 0x2c9   :  { %v438_v18 = vrot.slane %v5473_v1, %v5490_v13  ;;  %v4418_v20 = vld [vmem:[#allocation15 + $0x388] ss:$16 sps:$4 sm:$0xff]   ;;  %v4423_v21 = vld [vmem:[#allocation15 + $0x3a4] ss:$16 sps:$4 sm:$0xff]   ;;  %v4426_v63 = vld [vmem:[#allocation15 + $0x3ac] ss:$16 sps:$4 sm:$0xff]  }
 0x2ca   :  { %1514 = vmatprep.mubr.bf16.mxu0 %v689_v24  ;;  %1596 = vmatprep.mubr.bf16.mxu1 %v689_v24  ;;  %v4421_v23 = vld [vmem:[#allocation15 + $0x3a0] ss:$16 sps:$4 sm:$0xff]   ;;  %v4424_v24 = vld [vmem:[#allocation15 + $0x3a8] ss:$16 sps:$4 sm:$0xff]  }
 0x2cb   :  { %1515 = vmatmul.mubr.bf16.vlgmr.msra.gmra.mrb[8].mxu0 %v688_v27  ;;  %1597 = vmatmul.mubr.bf16.vlgmr.msra.gmra.mrb[8].mxu1 %v688_v27  ;;  %v670_v22 = vadd.f32 %v5487_v8, %v438_v18  ;;  %v4427_v1 = vld [vmem:[#allocation15 + $0x3c0] ss:$16 sps:$4 sm:$0xff]   ;;  %v4430_v27 = vld [vmem:[#allocation15 + $0x3c8] ss:$16 sps:$4 sm:$0xff]  }
 0x2cc   :  { %1524 = vmatpush1.bf16.msra.mxu0 %v4343_v25  ;;  %1606 = vmatpush1.bf16.msra.mxu1 %v4346_v26  ;;  %v4429_v25 = vld [vmem:[#allocation15 + $0x3c4] ss:$16 sps:$4 sm:$0xff]   ;;  %v4432_v26 = vld [vmem:[#allocation15 + $0x3cc] ss:$16 sps:$4 sm:$0xff]   ;;  %v4433_v8 = vld [vmem:[#allocation15 + $0x3e0] ss:$16 sps:$4 sm:$0xff]  }
 0x2cd   :  { %1555 = vmatprep.mubr.bf16.mxu0 %v691_v30  ;;  %1637 = vmatprep.mubr.bf16.mxu1 %v691_v30  ;;  %vm678_vm12 = vcmp.gt.f32.partialorder %v670_v22, 0.0  ;;  %v4504_v18 = vld [vmem:[#allocation18 + $0x14c] ss:$16 sps:$4 sm:$0xff]  }
 0x2ce   :  { %1525 = vmatprep.subr.bf16.mxu0 %v4351_v28  ;;  %1607 = vmatprep.subr.bf16.mxu1 %v4354_v29  ;;  %v4435_v28 = vld [vmem:[#allocation15 + $0x3e4] ss:$16 sps:$4 sm:$0xff]   ;;  %v4438_v29 = vld [vmem:[#allocation15 + $0x3ec] ss:$16 sps:$4 sm:$0xff]   ;;  %v682_v30 = vsel %vm678_vm12, %v670_v22, 0.0 }
 0x2cf   :  { %v4505_v22 = vld [vmem:[#allocation18 + $0x160] ss:$16 sps:$4 sm:$0xff]  }
 0x2d0   :  { %1526 = vmatpush1.bf16.msra.mxu0 %v4349_v31  ;;  %1608 = vmatpush1.bf16.msra.mxu1 %v4352_v32  ;;  %v4436_v31 = vld [vmem:[#allocation15 + $0x3e8] ss:$16 sps:$4 sm:$0xff]   ;;  %v686_v32 = vmin.f32 %v682_v30, 3.4028235e+38  ;;  %v4520_v30 = vld [vmem:[#allocation18 + $0x1a8] ss:$16 sps:$4 sm:$0xff]  }
 0x2d1   :  { %1527 = vmatprep.subr.bf16.mxu0 %v4357_v33  ;;  %1609 = vmatprep.subr.bf16.mxu1 %v4360_v34  ;;  %v4441_v33 = vld [vmem:[#allocation18 + $0x4] ss:$16 sps:$4 sm:$0xff]   ;;  %v4444_v34 = vld [vmem:[#allocation18 + $0xc] ss:$16 sps:$4 sm:$0xff]  }
 0x2d4   :  { %1528 = vmatpush1.bf16.msra.mxu0 %v4355_v35  ;;  %1610 = vmatpush1.bf16.msra.mxu1 %v4358_v36  ;;  %v4439_v35 = vld [vmem:[#allocation18] ss:$16 sps:$4 sm:$0xff]   ;;  %v4442_v36 = vld [vmem:[#allocation18 + $0x8] ss:$16 sps:$4 sm:$0xff]  }
 0x2d5   :  { %1529 = vmatprep.subr.bf16.mxu0 %v4363_v37  ;;  %1611 = vmatprep.subr.bf16.mxu1 %v4366_v38  ;;  %v690_v37 = vpack.c.bf16 %v686_v32, %v686_v32  ;;  %v4447_v38 = vld [vmem:[#allocation18 + $0x24] ss:$16 sps:$4 sm:$0xff]   ;;  %v4523_v32 = vld [vmem:[#allocation18 + $0x1c0] ss:$16 sps:$4 sm:$0xff]  }
 0x2d8   :  { %1530 = vmatpush1.bf16.msra.mxu0 %v4361_v39  ;;  %1612 = vmatpush1.bf16.msra.mxu1 %v4364_v40  ;;  %v4450_v39 = vld [vmem:[#allocation18 + $0x2c] ss:$16 sps:$4 sm:$0xff]   ;;  %v4445_v40 = vld [vmem:[#allocation18 + $0x20] ss:$16 sps:$4 sm:$0xff]  }
 0x2d9   :  { %1531 = vmatprep.subr.bf16.mxu0 %v4369_v41  ;;  %1613 = vmatprep.subr.bf16.mxu1 %v4372_v42  ;;  %v4448_v41 = vld [vmem:[#allocation18 + $0x28] ss:$16 sps:$4 sm:$0xff]   ;;  %v4453_v42 = vld [vmem:[#allocation18 + $0x44] ss:$16 sps:$4 sm:$0xff]  }
 0x2dc   :  { %1532 = vmatpush1.bf16.msra.mxu0 %v4367_v43  ;;  %1614 = vmatpush1.bf16.msra.mxu1 %v4370_v44  ;;  %v4456_v43 = vld [vmem:[#allocation18 + $0x4c] ss:$16 sps:$4 sm:$0xff]   ;;  %v4451_v44 = vld [vmem:[#allocation18 + $0x40] ss:$16 sps:$4 sm:$0xff]  }
 0x2dd   :  { %1533 = vmatprep.subr.bf16.mxu0 %v4375_v45  ;;  %1615 = vmatprep.subr.bf16.mxu1 %v4378_v46  ;;  %v4454_v45 = vld [vmem:[#allocation18 + $0x48] ss:$16 sps:$4 sm:$0xff]   ;;  %v4459_v46 = vld [vmem:[#allocation18 + $0x64] ss:$16 sps:$4 sm:$0xff]  }
 0x2e0   :  { %1534 = vmatpush1.bf16.msra.mxu0 %v4373_v47  ;;  %1616 = vmatpush1.bf16.msra.mxu1 %v4376_v48  ;;  %v4462_v47 = vld [vmem:[#allocation18 + $0x6c] ss:$16 sps:$4 sm:$0xff]   ;;  %v4457_v48 = vld [vmem:[#allocation18 + $0x60] ss:$16 sps:$4 sm:$0xff]  }
 0x2e1   :  { %1535 = vmatprep.subr.bf16.mxu0 %v4381_v49  ;;  %1617 = vmatprep.subr.bf16.mxu1 %v4384_v50  ;;  %v4460_v49 = vld [vmem:[#allocation18 + $0x68] ss:$16 sps:$4 sm:$0xff]   ;;  %v4465_v50 = vld [vmem:[#allocation18 + $0x84] ss:$16 sps:$4 sm:$0xff]  }
 0x2e4   :  { %1536 = vmatpush1.bf16.msra.mxu0 %v4379_v51  ;;  %1618 = vmatpush1.bf16.msra.mxu1 %v4382_v52  ;;  %v4468_v51 = vld [vmem:[#allocation18 + $0x8c] ss:$16 sps:$4 sm:$0xff]   ;;  %v4463_v52 = vld [vmem:[#allocation18 + $0x80] ss:$16 sps:$4 sm:$0xff]  }
 0x2e5   :  { %1537 = vmatprep.subr.bf16.mxu0 %v4387_v53  ;;  %1619 = vmatprep.subr.bf16.mxu1 %v4390_v54  ;;  %v4466_v53 = vld [vmem:[#allocation18 + $0x88] ss:$16 sps:$4 sm:$0xff]   ;;  %v4471_v54 = vld [vmem:[#allocation18 + $0xa4] ss:$16 sps:$4 sm:$0xff]  }
 0x2e8   :  { %1538 = vmatpush1.bf16.msra.mxu0 %v4385_v55  ;;  %1620 = vmatpush1.bf16.msra.mxu1 %v4388_v56  ;;  %v4474_v55 = vld [vmem:[#allocation18 + $0xac] ss:$16 sps:$4 sm:$0xff]   ;;  %v4469_v56 = vld [vmem:[#allocation18 + $0xa0] ss:$16 sps:$4 sm:$0xff]  }
 0x2e9   :  { %1539 = vmatprep.subr.bf16.mxu0 %v4393_v57  ;;  %1621 = vmatprep.subr.bf16.mxu1 %v4396_v58  ;;  %v4472_v57 = vld [vmem:[#allocation18 + $0xa8] ss:$16 sps:$4 sm:$0xff]   ;;  %v4477_v58 = vld [vmem:[#allocation18 + $0xc4] ss:$16 sps:$4 sm:$0xff]  }
 0x2ec   :  { %1540 = vmatpush1.bf16.msra.mxu0 %v4391_v59  ;;  %1622 = vmatpush1.bf16.msra.mxu1 %v4394_v60  ;;  %v4480_v59 = vld [vmem:[#allocation18 + $0xcc] ss:$16 sps:$4 sm:$0xff]   ;;  %v4475_v60 = vld [vmem:[#allocation18 + $0xc0] ss:$16 sps:$4 sm:$0xff]  }
 0x2ed   :  { %1541 = vmatprep.subr.bf16.mxu0 %v4399_v61  ;;  %1623 = vmatprep.subr.bf16.mxu1 %v4402_v62  ;;  %v4478_v61 = vld [vmem:[#allocation18 + $0xc8] ss:$16 sps:$4 sm:$0xff]   ;;  %v4483_v62 = vld [vmem:[#allocation18 + $0xe4] ss:$16 sps:$4 sm:$0xff]  }
 0x2f0   :  { %1542 = vmatpush1.bf16.msra.mxu0 %v4397_v4  ;;  %1624 = vmatpush1.bf16.msra.mxu1 %v4400_v5  ;;  %v4486_v4 = vld [vmem:[#allocation18 + $0xec] ss:$16 sps:$4 sm:$0xff]   ;;  %v4481_v5 = vld [vmem:[#allocation18 + $0xe0] ss:$16 sps:$4 sm:$0xff]  }
 0x2f1   :  { %1543 = vmatprep.subr.bf16.mxu0 %v4405_v6  ;;  %1625 = vmatprep.subr.bf16.mxu1 %v4408_v7  ;;  %v4484_v6 = vld [vmem:[#allocation18 + $0xe8] ss:$16 sps:$4 sm:$0xff]   ;;  %v4489_v7 = vld [vmem:[#allocation18 + $0x104] ss:$16 sps:$4 sm:$0xff]  }
 0x2f4   :  { %1544 = vmatpush1.bf16.msra.mxu0 %v4403_v9  ;;  %1626 = vmatpush1.bf16.msra.mxu1 %v4406_v10  ;;  %v4492_v9 = vld [vmem:[#allocation18 + $0x10c] ss:$16 sps:$4 sm:$0xff]   ;;  %v4487_v10 = vld [vmem:[#allocation18 + $0x100] ss:$16 sps:$4 sm:$0xff]  }
 0x2f5   :  { %1545 = vmatprep.subr.bf16.mxu0 %v4411_v11  ;;  %1627 = vmatprep.subr.bf16.mxu1 %v4414_v12  ;;  %v4490_v11 = vld [vmem:[#allocation18 + $0x108] ss:$16 sps:$4 sm:$0xff]   ;;  %v4495_v12 = vld [vmem:[#allocation18 + $0x124] ss:$16 sps:$4 sm:$0xff]  }
 0x2f8   :  { %1546 = vmatpush1.bf16.msra.mxu0 %v4409_v14  ;;  %1628 = vmatpush1.bf16.msra.mxu1 %v4412_v15  ;;  %v4498_v14 = vld [vmem:[#allocation18 + $0x12c] ss:$16 sps:$4 sm:$0xff]   ;;  %v4493_v15 = vld [vmem:[#allocation18 + $0x120] ss:$16 sps:$4 sm:$0xff]  }
 0x2f9   :  { %1547 = vmatprep.subr.bf16.mxu0 %v4417_v16  ;;  %1629 = vmatprep.subr.bf16.mxu1 %v4420_v17  ;;  %v4496_v16 = vld [vmem:[#allocation18 + $0x128] ss:$16 sps:$4 sm:$0xff]   ;;  %v4501_v17 = vld [vmem:[#allocation18 + $0x144] ss:$16 sps:$4 sm:$0xff]  }
 0x2fc   :  { %1548 = vmatpush1.bf16.msra.mxu0 %v4415_v19  ;;  %1630 = vmatpush1.bf16.msra.mxu1 %v4418_v20  ;;  %v4499_v19 = vld [vmem:[#allocation18 + $0x140] ss:$16 sps:$4 sm:$0xff]   ;;  %v4502_v20 = vld [vmem:[#allocation18 + $0x148] ss:$16 sps:$4 sm:$0xff]  }
 0x2fd   :  { %1549 = vmatprep.subr.bf16.mxu0 %v4423_v21  ;;  %1631 = vmatprep.subr.bf16.mxu1 %v4426_v63  ;;  %v4507_v21 = vld [vmem:[#allocation18 + $0x164] ss:$16 sps:$4 sm:$0xff]   ;;  %v4510_v63 = vld [vmem:[#allocation18 + $0x16c] ss:$16 sps:$4 sm:$0xff]  }
 0x300   :  { %1550 = vmatpush1.bf16.msra.mxu0 %v4421_v23  ;;  %1632 = vmatpush1.bf16.msra.mxu1 %v4424_v24  ;;  %v4508_v23 = vld [vmem:[#allocation18 + $0x168] ss:$16 sps:$4 sm:$0xff]   ;;  %v4513_v24 = vld [vmem:[#allocation18 + $0x184] ss:$16 sps:$4 sm:$0xff]  }
 0x301   :  { %1551 = vmatprep.subr.bf16.mxu0 %v4429_v25  ;;  %1633 = vmatprep.subr.bf16.mxu1 %v4432_v26  ;;  %v4516_v25 = vld [vmem:[#allocation18 + $0x18c] ss:$16 sps:$4 sm:$0xff]   ;;  %v4511_v26 = vld [vmem:[#allocation18 + $0x180] ss:$16 sps:$4 sm:$0xff]  }
 0x304   :  { %1552 = vmatpush1.bf16.msra.mxu0 %v4427_v1  ;;  %1634 = vmatpush1.bf16.msra.mxu1 %v4430_v27  ;;  %v4514_v1 = vld [vmem:[#allocation18 + $0x188] ss:$16 sps:$4 sm:$0xff]   ;;  %v4519_v27 = vld [vmem:[#allocation18 + $0x1a4] ss:$16 sps:$4 sm:$0xff]  }
 0x305   :  { %1553 = vmatprep.subr.bf16.mxu0 %v4435_v28  ;;  %1635 = vmatprep.subr.bf16.mxu1 %v4438_v29  ;;  %v4522_v28 = vld [vmem:[#allocation18 + $0x1ac] ss:$16 sps:$4 sm:$0xff]   ;;  %v4517_v29 = vld [vmem:[#allocation18 + $0x1a0] ss:$16 sps:$4 sm:$0xff]  }
 0x308   :  { %1554 = vmatpush1.bf16.msra.mxu0 %v4433_v8  ;;  %1636 = vmatpush1.bf16.msra.mxu1 %v4436_v31  ;;  %v4525_v8 = vld [vmem:[#allocation18 + $0x1c4] ss:$16 sps:$4 sm:$0xff]   ;;  %v4528_v31 = vld [vmem:[#allocation18 + $0x1cc] ss:$16 sps:$4 sm:$0xff]  }
 0x309   :  { %2452 = vmatprep.subr.bf16.mxu0 %v4441_v33  ;;  %2534 = vmatprep.subr.bf16.mxu1 %v4444_v34  ;;  %v4526_v33 = vld [vmem:[#allocation18 + $0x1c8] ss:$16 sps:$4 sm:$0xff]   ;;  %v4531_v34 = vld [vmem:[#allocation18 + $0x1e4] ss:$16 sps:$4 sm:$0xff]  }
 0x30b   :  { %1556 = vmatmul.mubr.bf16.vlgmr.msra.gmra.mrb[8].mxu0 %v690_v37  ;;  %1638 = vmatmul.mubr.bf16.vlgmr.msra.gmra.mrb[8].mxu1 %v690_v37  ;;  %v4532_v37 = vld [vmem:[#allocation18 + $0x1e8] ss:$16 sps:$4 sm:$0xff]  }
 0x30c   :  { %2453 = vmatpush1.bf16.msra.mxu0 %v4439_v35  ;;  %2535 = vmatpush1.bf16.msra.mxu1 %v4442_v36  ;;  %v4534_v35 = vld [vmem:[#allocation18 + $0x1ec] ss:$16 sps:$4 sm:$0xff]   ;;  %v4529_v36 = vld [vmem:[#allocation18 + $0x1e0] ss:$16 sps:$4 sm:$0xff]  }
 0x30d   :  { %2454 = vmatprep.subr.bf16.mxu0 %v4447_v38  ;;  %2536 = vmatprep.subr.bf16.mxu1 %v4450_v39  ;;  %v4537_v38 = vld [vmem:[#allocation18 + $0x204] ss:$16 sps:$4 sm:$0xff]   ;;  %v4540_v39 = vld [vmem:[#allocation18 + $0x20c] ss:$16 sps:$4 sm:$0xff]  }
 0x310   :  { %2455 = vmatpush1.bf16.msra.mxu0 %v4445_v40  ;;  %2537 = vmatpush1.bf16.msra.mxu1 %v4448_v41  ;;  %v5495_v40 = vld [vmem:[#allocation17] sm:$0xf] }
 0x311   :  { %2456 = vmatprep.subr.bf16.mxu0 %v4453_v42  ;;  %2538 = vmatprep.subr.bf16.mxu1 %v4456_v43  ;;  %v825_v41 = vrot.slane %v5495_v40, %v5471_v0  ;;  %v829_v42 = vrot.slane %v5495_v40, %v5476_v2  ;;  %v837_v43 = vrot.slane %v5495_v40, %v5479_v3 }
 0x314   :  { %2457 = vmatpush1.bf16.msra.mxu0 %v4451_v44  ;;  %2539 = vmatpush1.bf16.msra.mxu1 %v4454_v45 }
 0x315   :  { %2458 = vmatprep.subr.bf16.mxu0 %v4459_v46  ;;  %2540 = vmatprep.subr.bf16.mxu1 %v4462_v47 }
 0x318   :  { %2459 = vmatpush1.bf16.msra.mxu0 %v4457_v48  ;;  %2541 = vmatpush1.bf16.msra.mxu1 %v4460_v49 }
 0x319   :  { %2460 = vmatprep.subr.bf16.mxu0 %v4465_v50  ;;  %2542 = vmatprep.subr.bf16.mxu1 %v4468_v51 }
 0x31c   :  { %2461 = vmatpush1.bf16.msra.mxu0 %v4463_v52  ;;  %2543 = vmatpush1.bf16.msra.mxu1 %v4466_v53 }
 0x31d   :  { %2462 = vmatprep.subr.bf16.mxu0 %v4471_v54  ;;  %2544 = vmatprep.subr.bf16.mxu1 %v4474_v55 }
 0x320   :  { %2463 = vmatpush1.bf16.msra.mxu0 %v4469_v56  ;;  %2545 = vmatpush1.bf16.msra.mxu1 %v4472_v57 }
 0x321   :  { %2464 = vmatprep.subr.bf16.mxu0 %v4477_v58  ;;  %2546 = vmatprep.subr.bf16.mxu1 %v4480_v59 }
 0x324   :  { %2465 = vmatpush1.bf16.msra.mxu0 %v4475_v60  ;;  %2547 = vmatpush1.bf16.msra.mxu1 %v4478_v61 }
 0x325   :  { %2466 = vmatprep.subr.bf16.mxu0 %v4483_v62  ;;  %2548 = vmatprep.subr.bf16.mxu1 %v4486_v4  ;;  %v4535_v62 = vld [vmem:[#allocation18 + $0x200] ss:$16 sps:$4 sm:$0xff]   ;;  %v4538_v4 = vld [vmem:[#allocation18 + $0x208] ss:$16 sps:$4 sm:$0xff]  }
 0x328   :  { %2467 = vmatpush1.bf16.msra.mxu0 %v4481_v5  ;;  %2549 = vmatpush1.bf16.msra.mxu1 %v4484_v6  ;;  %v4543_v6 = vld [vmem:[#allocation18 + $0x224] ss:$16 sps:$4 sm:$0xff]  }
 0x329   :  { %2468 = vmatprep.subr.bf16.mxu0 %v4489_v7  ;;  %2550 = vmatprep.subr.bf16.mxu1 %v4492_v9  ;;  %v4546_v7 = vld [vmem:[#allocation18 + $0x22c] ss:$16 sps:$4 sm:$0xff]  }
 0x32c   :  { %2469 = vmatpush1.bf16.msra.mxu0 %v4487_v10  ;;  %2551 = vmatpush1.bf16.msra.mxu1 %v4490_v11  ;;  %v4541_v10 = vld [vmem:[#allocation18 + $0x220] ss:$16 sps:$4 sm:$0xff]   ;;  %v4544_v11 = vld [vmem:[#allocation18 + $0x228] ss:$16 sps:$4 sm:$0xff]  }
 0x32d   :  { %2470 = vmatprep.subr.bf16.mxu0 %v4495_v12  ;;  %2552 = vmatprep.subr.bf16.mxu1 %v4498_v14  ;;  %v4549_v12 = vld [vmem:[#allocation18 + $0x244] ss:$16 sps:$4 sm:$0xff]   ;;  %v4552_v14 = vld [vmem:[#allocation18 + $0x24c] ss:$16 sps:$4 sm:$0xff]  }
 0x330   :  { %2471 = vmatpush1.bf16.msra.mxu0 %v4493_v15  ;;  %2553 = vmatpush1.bf16.msra.mxu1 %v4496_v16  ;;  %v4547_v15 = vld [vmem:[#allocation18 + $0x240] ss:$16 sps:$4 sm:$0xff]   ;;  %v4550_v16 = vld [vmem:[#allocation18 + $0x248] ss:$16 sps:$4 sm:$0xff]  }
 0x331   :  { %2472 = vmatprep.subr.bf16.mxu0 %v4501_v17  ;;  %2554 = vmatprep.subr.bf16.mxu1 %v4504_v18  ;;  %v4555_v17 = vld [vmem:[#allocation18 + $0x264] ss:$16 sps:$4 sm:$0xff]   ;;  %v4558_v18 = vld [vmem:[#allocation18 + $0x26c] ss:$16 sps:$4 sm:$0xff]  }
 0x334   :  { %2473 = vmatpush1.bf16.msra.mxu0 %v4499_v19  ;;  %2555 = vmatpush1.bf16.msra.mxu1 %v4502_v20  ;;  %v4553_v19 = vld [vmem:[#allocation18 + $0x260] ss:$16 sps:$4 sm:$0xff]   ;;  %v4556_v20 = vld [vmem:[#allocation18 + $0x268] ss:$16 sps:$4 sm:$0xff]  }
 0x335   :  { %2474 = vmatprep.subr.bf16.mxu0 %v4507_v21  ;;  %2556 = vmatprep.subr.bf16.mxu1 %v4510_v63  ;;  %v4561_v21 = vld [vmem:[#allocation18 + $0x284] ss:$16 sps:$4 sm:$0xff]   ;;  %v4564_v63 = vld [vmem:[#allocation18 + $0x28c] ss:$16 sps:$4 sm:$0xff]  }
 0x338   :  { %2475 = vmatpush1.bf16.msra.mxu0 %v4505_v22  ;;  %2557 = vmatpush1.bf16.msra.mxu1 %v4508_v23  ;;  %v4559_v22 = vld [vmem:[#allocation18 + $0x280] ss:$16 sps:$4 sm:$0xff]   ;;  %v4562_v23 = vld [vmem:[#allocation18 + $0x288] ss:$16 sps:$4 sm:$0xff]  }
 0x339   :  { %2476 = vmatprep.subr.bf16.mxu0 %v4513_v24  ;;  %2558 = vmatprep.subr.bf16.mxu1 %v4516_v25  ;;  %v4567_v24 = vld [vmem:[#allocation18 + $0x2a4] ss:$16 sps:$4 sm:$0xff]   ;;  %v4570_v25 = vld [vmem:[#allocation18 + $0x2ac] ss:$16 sps:$4 sm:$0xff]  }
 0x33c   :  { %2477 = vmatpush1.bf16.msra.mxu0 %v4511_v26  ;;  %2559 = vmatpush1.bf16.msra.mxu1 %v4514_v1  ;;  %v4565_v26 = vld [vmem:[#allocation18 + $0x2a0] ss:$16 sps:$4 sm:$0xff]   ;;  %v4568_v1 = vld [vmem:[#allocation18 + $0x2a8] ss:$16 sps:$4 sm:$0xff]  }
 0x33d   :  { %2478 = vmatprep.subr.bf16.mxu0 %v4519_v27  ;;  %2560 = vmatprep.subr.bf16.mxu1 %v4522_v28  ;;  %v4573_v27 = vld [vmem:[#allocation18 + $0x2c4] ss:$16 sps:$4 sm:$0xff]   ;;  %v4576_v28 = vld [vmem:[#allocation18 + $0x2cc] ss:$16 sps:$4 sm:$0xff]  }
 0x340   :  { %2479 = vmatpush1.bf16.msra.mxu0 %v4517_v29  ;;  %2561 = vmatpush1.bf16.msra.mxu1 %v4520_v30  ;;  %v4571_v29 = vld [vmem:[#allocation18 + $0x2c0] ss:$16 sps:$4 sm:$0xff]   ;;  %v4574_v30 = vld [vmem:[#allocation18 + $0x2c8] ss:$16 sps:$4 sm:$0xff]  }
 0x341   :  { %2480 = vmatprep.subr.bf16.mxu0 %v4525_v8  ;;  %2562 = vmatprep.subr.bf16.mxu1 %v4528_v31  ;;  %v4579_v8 = vld [vmem:[#allocation18 + $0x2e4] ss:$16 sps:$4 sm:$0xff]   ;;  %v4582_v31 = vld [vmem:[#allocation18 + $0x2ec] ss:$16 sps:$4 sm:$0xff]  }
 0x344   :  { %2481 = vmatpush1.bf16.msra.mxu0 %v4523_v32  ;;  %2563 = vmatpush1.bf16.msra.mxu1 %v4526_v33  ;;  %v4577_v32 = vld [vmem:[#allocation18 + $0x2e0] ss:$16 sps:$4 sm:$0xff]   ;;  %v4580_v33 = vld [vmem:[#allocation18 + $0x2e8] ss:$16 sps:$4 sm:$0xff]  }
 0x345   :  { %2482 = vmatprep.subr.bf16.mxu0 %v4531_v34  ;;  %2564 = vmatprep.subr.bf16.mxu1 %v4534_v35  ;;  %v4585_v34 = vld [vmem:[#allocation18 + $0x304] ss:$16 sps:$4 sm:$0xff]   ;;  %v4588_v35 = vld [vmem:[#allocation18 + $0x30c] ss:$16 sps:$4 sm:$0xff]  }
 0x348   :  { %2483 = vmatpush1.bf16.msra.mxu0 %v4529_v36  ;;  %2565 = vmatpush1.bf16.msra.mxu1 %v4532_v37  ;;  %v4583_v36 = vld [vmem:[#allocation18 + $0x300] ss:$16 sps:$4 sm:$0xff]   ;;  %v4586_v37 = vld [vmem:[#allocation18 + $0x308] ss:$16 sps:$4 sm:$0xff]  }
 0x349   :  { %2493 = vmatprep.subr.bf16.mxu0 %v4537_v38  ;;  %2575 = vmatprep.subr.bf16.mxu1 %v4540_v39  ;;  %v4591_v38 = vld [vmem:[#allocation18 + $0x324] ss:$16 sps:$4 sm:$0xff]   ;;  %v4594_v39 = vld [vmem:[#allocation18 + $0x32c] ss:$16 sps:$4 sm:$0xff]  }
 0x3de   :  { %v1557_v44 = vpop.f32.mrb[8].mxu0  ;;  %v5503_v45 = vpop.f32.mrb[8].mxu1 }
 0x3df   :  { %v4140_v46 = vadd.f32 %v1557_v44, %v825_v41  ;;  %v1559_v47 = vpop.f32.mrb[9].mxu0  ;;  %v1641_v48 = vpop.f32.mrb[9].mxu1  ;;  %v4589_v41 = vld [vmem:[#allocation18 + $0x320] ss:$16 sps:$4 sm:$0xff]   ;;  %v4600_v44 = vld [vmem:[#allocation18 + $0x34c] ss:$16 sps:$4 sm:$0xff]  }
 0x3e0   :  { %v4141_v49 = vadd.f32 %v1559_v47, %v829_v42  ;;  %v4143_v50 = vadd.f32 %v1641_v48, %v837_v43  ;;  %v1561_v51 = vpop.f32.mrb[10].mxu0  ;;  %v1643_v52 = vpop.f32.mrb[10].mxu1  ;;  %v4592_v42 = vld [vmem:[#allocation18 + $0x328] ss:$16 sps:$4 sm:$0xff]   ;;  %v4597_v43 = vld [vmem:[#allocation18 + $0x344] ss:$16 sps:$4 sm:$0xff]  }
 0x3e1   :  { %vm1646_vm13 = vcmp.gt.f32.partialorder %v4140_v46, 0.0  ;;  %v1562_v53 = vpop.f32.mrb[11].mxu0  ;;  %v1644_v54 = vpop.f32.mrb[11].mxu1  ;;  %v4598_v47 = vld [vmem:[#allocation18 + $0x348] ss:$16 sps:$4 sm:$0xff]  }
 0x3e2   :  { %v1650_v55 = vsel %vm1646_vm13, %v4140_v46, 0.0  ;;  %vm1647_vm14 = vcmp.gt.f32.partialorder %v4141_v49, 0.0  ;;  %vm1649_vm15 = vcmp.gt.f32.partialorder %v4143_v50, 0.0  ;;  %v4595_v46 = vld [vmem:[#allocation18 + $0x340] ss:$16 sps:$4 sm:$0xff]   ;;  %v833_v54 = vrot.slane %v5495_v40, %v5490_v13 }
 0x3e3   :  { %v1654_v56 = vmin.f32 %v1650_v55, 3.4028235e+38  ;;  %v1651_v57 = vsel %vm1647_vm14, %v4141_v49, 0.0  ;;  %v1653_v58 = vsel %vm1649_vm15, %v4143_v50, 0.0  ;;  %v4603_v48 = vld [vmem:[#allocation18 + $0x364] ss:$16 sps:$4 sm:$0xff]  }
 0x3e4   :  { %v1655_v59 = vmin.f32 %v1651_v57, 3.4028235e+38  ;;  %v1657_v60 = vmin.f32 %v1653_v58, 3.4028235e+38  ;;  %v4606_v49 = vld [vmem:[#allocation18 + $0x36c] ss:$16 sps:$4 sm:$0xff]  }
 0x3e5   :  { %v1658_v5 = vpack.c.bf16 %v1654_v56, %v1654_v56  ;;  %v4601_v50 = vld [vmem:[#allocation18 + $0x360] ss:$16 sps:$4 sm:$0xff]   ;;  %v4604_v51 = vld [vmem:[#allocation18 + $0x368] ss:$16 sps:$4 sm:$0xff]   ;;  %v4609_v52 = vld [vmem:[#allocation18 + $0x384] ss:$16 sps:$4 sm:$0xff]  }
 0x3e6   :  { %v1659_v61 = vpack.c.bf16 %v1655_v59, %v1655_v59  ;;  %v1661_v9 = vpack.c.bf16 %v1657_v60, %v1657_v60  ;;  %v4612_v53 = vld [vmem:[#allocation18 + $0x38c] ss:$16 sps:$4 sm:$0xff]   ;;  %v4607_v55 = vld [vmem:[#allocation18 + $0x380] ss:$16 sps:$4 sm:$0xff]   ;;  %v4610_v56 = vld [vmem:[#allocation18 + $0x388] ss:$16 sps:$4 sm:$0xff]   ;;  %v4142_v59 = vadd.f32 %v5503_v45, %v833_v54 }
 0x3e7   :  { %v4615_v57 = vld [vmem:[#allocation18 + $0x3a4] ss:$16 sps:$4 sm:$0xff]   ;;  %v4618_v58 = vld [vmem:[#allocation18 + $0x3ac] ss:$16 sps:$4 sm:$0xff]   ;;  %v4613_v60 = vld [vmem:[#allocation18 + $0x3a0] ss:$16 sps:$4 sm:$0xff]  }
 0x3e8   :  { %2484 = vmatprep.mubr.bf16.mxu0 %v1659_v61  ;;  %2566 = vmatprep.mubr.bf16.mxu1 %v1659_v61  ;;  %v4616_v61 = vld [vmem:[#allocation18 + $0x3a8] ss:$16 sps:$4 sm:$0xff]   ;;  %vm1648_vm0 = vcmp.gt.f32.partialorder %v4142_v59, 0.0  ;;  %v4619_v40 = vld [vmem:[#allocation18 + $0x3c0] ss:$16 sps:$4 sm:$0xff]  }
 0x3e9   :  { %2485 = vmatmul.mubr.bf16.vlgmr.msra.gmra.mrb[12].mxu0 %v1658_v5  ;;  %2567 = vmatmul.mubr.bf16.vlgmr.msra.gmra.mrb[12].mxu1 %v1658_v5  ;;  %v4622_v5 = vld [vmem:[#allocation18 + $0x3c8] ss:$16 sps:$4 sm:$0xff]   ;;  %v4625_v45 = vld [vmem:[#allocation18 + $0x3e0] ss:$16 sps:$4 sm:$0xff]  }
 0x3ea   :  { %2494 = vmatpush1.bf16.msra.mxu0 %v4535_v62  ;;  %2576 = vmatpush1.bf16.msra.mxu1 %v4538_v4  ;;  %v4621_v62 = vld [vmem:[#allocation18 + $0x3c4] ss:$16 sps:$4 sm:$0xff]   ;;  %v4624_v4 = vld [vmem:[#allocation18 + $0x3cc] ss:$16 sps:$4 sm:$0xff]   ;;  %v4696_v54 = vld [vmem:[#allocation21 + $0x14c] ss:$16 sps:$4 sm:$0xff]  }
 0x3eb   :  { %2525 = vmatprep.mubr.bf16.mxu0 %v1661_v9  ;;  %2607 = vmatprep.mubr.bf16.mxu1 %v1661_v9  ;;  %v1652_v9 = vsel %vm1648_vm0, %v4142_v59, 0.0  ;;  %v4697_v59 = vld [vmem:[#allocation21 + $0x160] ss:$16 sps:$4 sm:$0xff]  }
 0x3ec   :  { %2495 = vmatprep.subr.bf16.mxu0 %v4543_v6  ;;  %2577 = vmatprep.subr.bf16.mxu1 %v4546_v7  ;;  %v4627_v6 = vld [vmem:[#allocation18 + $0x3e4] ss:$16 sps:$4 sm:$0xff]   ;;  %v4630_v7 = vld [vmem:[#allocation18 + $0x3ec] ss:$16 sps:$4 sm:$0xff]  }
 0x3ee   :  { %2496 = vmatpush1.bf16.msra.mxu0 %v4541_v10  ;;  %2578 = vmatpush1.bf16.msra.mxu1 %v4544_v11  ;;  %v4628_v10 = vld [vmem:[#allocation18 + $0x3e8] ss:$16 sps:$4 sm:$0xff]   ;;  %v1656_v11 = vmin.f32 %v1652_v9, 3.4028235e+38  ;;  %v4712_v9 = vld [vmem:[#allocation21 + $0x1a8] ss:$16 sps:$4 sm:$0xff]  }
 0x3ef   :  { %2497 = vmatprep.subr.bf16.mxu0 %v4549_v12  ;;  %2579 = vmatprep.subr.bf16.mxu1 %v4552_v14  ;;  %v4633_v12 = vld [vmem:[#allocation21 + $0x4] ss:$16 sps:$4 sm:$0xff]   ;;  %v4636_v14 = vld [vmem:[#allocation21 + $0xc] ss:$16 sps:$4 sm:$0xff]  }
 0x3f2   :  { %2498 = vmatpush1.bf16.msra.mxu0 %v4547_v15  ;;  %2580 = vmatpush1.bf16.msra.mxu1 %v4550_v16  ;;  %v4631_v15 = vld [vmem:[#allocation21] ss:$16 sps:$4 sm:$0xff]   ;;  %v4634_v16 = vld [vmem:[#allocation21 + $0x8] ss:$16 sps:$4 sm:$0xff]  }
 0x3f3   :  { %2499 = vmatprep.subr.bf16.mxu0 %v4555_v17  ;;  %2581 = vmatprep.subr.bf16.mxu1 %v4558_v18  ;;  %v1660_v17 = vpack.c.bf16 %v1656_v11, %v1656_v11  ;;  %v4639_v18 = vld [vmem:[#allocation21 + $0x24] ss:$16 sps:$4 sm:$0xff]   ;;  %v4715_v11 = vld [vmem:[#allocation21 + $0x1c0] ss:$16 sps:$4 sm:$0xff]  }
 0x3f6   :  { %2500 = vmatpush1.bf16.msra.mxu0 %v4553_v19  ;;  %2582 = vmatpush1.bf16.msra.mxu1 %v4556_v20  ;;  %v4642_v19 = vld [vmem:[#allocation21 + $0x2c] ss:$16 sps:$4 sm:$0xff]   ;;  %v4637_v20 = vld [vmem:[#allocation21 + $0x20] ss:$16 sps:$4 sm:$0xff]  }
 0x3f7   :  { %2501 = vmatprep.subr.bf16.mxu0 %v4561_v21  ;;  %2583 = vmatprep.subr.bf16.mxu1 %v4564_v63  ;;  %v4640_v21 = vld [vmem:[#allocation21 + $0x28] ss:$16 sps:$4 sm:$0xff]   ;;  %v4645_v63 = vld [vmem:[#allocation21 + $0x44] ss:$16 sps:$4 sm:$0xff]  }
 0x3fa   :  { %2502 = vmatpush1.bf16.msra.mxu0 %v4559_v22  ;;  %2584 = vmatpush1.bf16.msra.mxu1 %v4562_v23  ;;  %v4648_v22 = vld [vmem:[#allocation21 + $0x4c] ss:$16 sps:$4 sm:$0xff]   ;;  %v4643_v23 = vld [vmem:[#allocation21 + $0x40] ss:$16 sps:$4 sm:$0xff]  }
 0x3fb   :  { %2503 = vmatprep.subr.bf16.mxu0 %v4567_v24  ;;  %2585 = vmatprep.subr.bf16.mxu1 %v4570_v25  ;;  %v4646_v24 = vld [vmem:[#allocation21 + $0x48] ss:$16 sps:$4 sm:$0xff]   ;;  %v4651_v25 = vld [vmem:[#allocation21 + $0x64] ss:$16 sps:$4 sm:$0xff]  }
 0x3fe   :  { %2504 = vmatpush1.bf16.msra.mxu0 %v4565_v26  ;;  %2586 = vmatpush1.bf16.msra.mxu1 %v4568_v1  ;;  %v4654_v26 = vld [vmem:[#allocation21 + $0x6c] ss:$16 sps:$4 sm:$0xff]   ;;  %v4649_v1 = vld [vmem:[#allocation21 + $0x60] ss:$16 sps:$4 sm:$0xff]  }
 0x3ff   :  { %2505 = vmatprep.subr.bf16.mxu0 %v4573_v27  ;;  %2587 = vmatprep.subr.bf16.mxu1 %v4576_v28  ;;  %v4652_v27 = vld [vmem:[#allocation21 + $0x68] ss:$16 sps:$4 sm:$0xff]   ;;  %v4657_v28 = vld [vmem:[#allocation21 + $0x84] ss:$16 sps:$4 sm:$0xff]  }
 0x402   :  { %2506 = vmatpush1.bf16.msra.mxu0 %v4571_v29  ;;  %2588 = vmatpush1.bf16.msra.mxu1 %v4574_v30  ;;  %v4660_v29 = vld [vmem:[#allocation21 + $0x8c] ss:$16 sps:$4 sm:$0xff]   ;;  %v4655_v30 = vld [vmem:[#allocation21 + $0x80] ss:$16 sps:$4 sm:$0xff]  }
 0x403   :  { %2507 = vmatprep.subr.bf16.mxu0 %v4579_v8  ;;  %2589 = vmatprep.subr.bf16.mxu1 %v4582_v31  ;;  %v4658_v8 = vld [vmem:[#allocation21 + $0x88] ss:$16 sps:$4 sm:$0xff]   ;;  %v4663_v31 = vld [vmem:[#allocation21 + $0xa4] ss:$16 sps:$4 sm:$0xff]  }
 0x406   :  { %2508 = vmatpush1.bf16.msra.mxu0 %v4577_v32  ;;  %2590 = vmatpush1.bf16.msra.mxu1 %v4580_v33  ;;  %v4666_v32 = vld [vmem:[#allocation21 + $0xac] ss:$16 sps:$4 sm:$0xff]   ;;  %v4661_v33 = vld [vmem:[#allocation21 + $0xa0] ss:$16 sps:$4 sm:$0xff]  }
 0x407   :  { %2509 = vmatprep.subr.bf16.mxu0 %v4585_v34  ;;  %2591 = vmatprep.subr.bf16.mxu1 %v4588_v35  ;;  %v4664_v34 = vld [vmem:[#allocation21 + $0xa8] ss:$16 sps:$4 sm:$0xff]   ;;  %v4669_v35 = vld [vmem:[#allocation21 + $0xc4] ss:$16 sps:$4 sm:$0xff]  }
 0x40a   :  { %2510 = vmatpush1.bf16.msra.mxu0 %v4583_v36  ;;  %2592 = vmatpush1.bf16.msra.mxu1 %v4586_v37  ;;  %v4672_v36 = vld [vmem:[#allocation21 + $0xcc] ss:$16 sps:$4 sm:$0xff]   ;;  %v4667_v37 = vld [vmem:[#allocation21 + $0xc0] ss:$16 sps:$4 sm:$0xff]  }
 0x40b   :  { %2511 = vmatprep.subr.bf16.mxu0 %v4591_v38  ;;  %2593 = vmatprep.subr.bf16.mxu1 %v4594_v39  ;;  %v4670_v38 = vld [vmem:[#allocation21 + $0xc8] ss:$16 sps:$4 sm:$0xff]   ;;  %v4675_v39 = vld [vmem:[#allocation21 + $0xe4] ss:$16 sps:$4 sm:$0xff]  }
 0x40e   :  { %2512 = vmatpush1.bf16.msra.mxu0 %v4589_v41  ;;  %2594 = vmatpush1.bf16.msra.mxu1 %v4592_v42  ;;  %v4678_v41 = vld [vmem:[#allocation21 + $0xec] ss:$16 sps:$4 sm:$0xff]   ;;  %v4673_v42 = vld [vmem:[#allocation21 + $0xe0] ss:$16 sps:$4 sm:$0xff]  }
 0x40f   :  { %2513 = vmatprep.subr.bf16.mxu0 %v4597_v43  ;;  %2595 = vmatprep.subr.bf16.mxu1 %v4600_v44  ;;  %v4676_v43 = vld [vmem:[#allocation21 + $0xe8] ss:$16 sps:$4 sm:$0xff]   ;;  %v4681_v44 = vld [vmem:[#allocation21 + $0x104] ss:$16 sps:$4 sm:$0xff]  }
 0x412   :  { %2514 = vmatpush1.bf16.msra.mxu0 %v4595_v46  ;;  %2596 = vmatpush1.bf16.msra.mxu1 %v4598_v47  ;;  %v4684_v46 = vld [vmem:[#allocation21 + $0x10c] ss:$16 sps:$4 sm:$0xff]   ;;  %v4679_v47 = vld [vmem:[#allocation21 + $0x100] ss:$16 sps:$4 sm:$0xff]  }
 0x413   :  { %2515 = vmatprep.subr.bf16.mxu0 %v4603_v48  ;;  %2597 = vmatprep.subr.bf16.mxu1 %v4606_v49  ;;  %v4682_v48 = vld [vmem:[#allocation21 + $0x108] ss:$16 sps:$4 sm:$0xff]   ;;  %v4687_v49 = vld [vmem:[#allocation21 + $0x124] ss:$16 sps:$4 sm:$0xff]  }
 0x416   :  { %2516 = vmatpush1.bf16.msra.mxu0 %v4601_v50  ;;  %2598 = vmatpush1.bf16.msra.mxu1 %v4604_v51  ;;  %v4690_v50 = vld [vmem:[#allocation21 + $0x12c] ss:$16 sps:$4 sm:$0xff]   ;;  %v4685_v51 = vld [vmem:[#allocation21 + $0x120] ss:$16 sps:$4 sm:$0xff]  }
 0x417   :  { %2517 = vmatprep.subr.bf16.mxu0 %v4609_v52  ;;  %2599 = vmatprep.subr.bf16.mxu1 %v4612_v53  ;;  %v4688_v52 = vld [vmem:[#allocation21 + $0x128] ss:$16 sps:$4 sm:$0xff]   ;;  %v4693_v53 = vld [vmem:[#allocation21 + $0x144] ss:$16 sps:$4 sm:$0xff]  }
 0x41a   :  { %2518 = vmatpush1.bf16.msra.mxu0 %v4607_v55  ;;  %2600 = vmatpush1.bf16.msra.mxu1 %v4610_v56  ;;  %v4691_v55 = vld [vmem:[#allocation21 + $0x140] ss:$16 sps:$4 sm:$0xff]   ;;  %v4694_v56 = vld [vmem:[#allocation21 + $0x148] ss:$16 sps:$4 sm:$0xff]  }
 0x41b   :  { %2519 = vmatprep.subr.bf16.mxu0 %v4615_v57  ;;  %2601 = vmatprep.subr.bf16.mxu1 %v4618_v58  ;;  %v4699_v57 = vld [vmem:[#allocation21 + $0x164] ss:$16 sps:$4 sm:$0xff]   ;;  %v4702_v58 = vld [vmem:[#allocation21 + $0x16c] ss:$16 sps:$4 sm:$0xff]  }
 0x41e   :  { %2520 = vmatpush1.bf16.msra.mxu0 %v4613_v60  ;;  %2602 = vmatpush1.bf16.msra.mxu1 %v4616_v61  ;;  %v4700_v60 = vld [vmem:[#allocation21 + $0x168] ss:$16 sps:$4 sm:$0xff]   ;;  %v4705_v61 = vld [vmem:[#allocation21 + $0x184] ss:$16 sps:$4 sm:$0xff]  }
 0x41f   :  { %2521 = vmatprep.subr.bf16.mxu0 %v4621_v62  ;;  %2603 = vmatprep.subr.bf16.mxu1 %v4624_v4  ;;  %v4708_v62 = vld [vmem:[#allocation21 + $0x18c] ss:$16 sps:$4 sm:$0xff]   ;;  %v4703_v4 = vld [vmem:[#allocation21 + $0x180] ss:$16 sps:$4 sm:$0xff]  }
 0x422   :  { %2522 = vmatpush1.bf16.msra.mxu0 %v4619_v40  ;;  %2604 = vmatpush1.bf16.msra.mxu1 %v4622_v5  ;;  %v4706_v40 = vld [vmem:[#allocation21 + $0x188] ss:$16 sps:$4 sm:$0xff]   ;;  %v4711_v5 = vld [vmem:[#allocation21 + $0x1a4] ss:$16 sps:$4 sm:$0xff]  }
 0x423   :  { %2523 = vmatprep.subr.bf16.mxu0 %v4627_v6  ;;  %2605 = vmatprep.subr.bf16.mxu1 %v4630_v7  ;;  %v4714_v6 = vld [vmem:[#allocation21 + $0x1ac] ss:$16 sps:$4 sm:$0xff]   ;;  %v4709_v7 = vld [vmem:[#allocation21 + $0x1a0] ss:$16 sps:$4 sm:$0xff]  }
 0x426   :  { %2524 = vmatpush1.bf16.msra.mxu0 %v4625_v45  ;;  %2606 = vmatpush1.bf16.msra.mxu1 %v4628_v10  ;;  %v4717_v45 = vld [vmem:[#allocation21 + $0x1c4] ss:$16 sps:$4 sm:$0xff]   ;;  %v4720_v10 = vld [vmem:[#allocation21 + $0x1cc] ss:$16 sps:$4 sm:$0xff]  }
 0x427   :  { %3422 = vmatprep.subr.bf16.mxu0 %v4633_v12  ;;  %3504 = vmatprep.subr.bf16.mxu1 %v4636_v14  ;;  %v4718_v12 = vld [vmem:[#allocation21 + $0x1c8] ss:$16 sps:$4 sm:$0xff]   ;;  %v4723_v14 = vld [vmem:[#allocation21 + $0x1e4] ss:$16 sps:$4 sm:$0xff]  }
 0x429   :  { %2526 = vmatmul.mubr.bf16.vlgmr.msra.gmra.mrb[12].mxu0 %v1660_v17  ;;  %2608 = vmatmul.mubr.bf16.vlgmr.msra.gmra.mrb[12].mxu1 %v1660_v17  ;;  %v4724_v17 = vld [vmem:[#allocation21 + $0x1e8] ss:$16 sps:$4 sm:$0xff]  }
 0x42a   :  { %3423 = vmatpush1.bf16.msra.mxu0 %v4631_v15  ;;  %3505 = vmatpush1.bf16.msra.mxu1 %v4634_v16  ;;  %v4726_v15 = vld [vmem:[#allocation21 + $0x1ec] ss:$16 sps:$4 sm:$0xff]   ;;  %v4721_v16 = vld [vmem:[#allocation21 + $0x1e0] ss:$16 sps:$4 sm:$0xff]  }
 0x42b   :  { %3424 = vmatprep.subr.bf16.mxu0 %v4639_v18  ;;  %3506 = vmatprep.subr.bf16.mxu1 %v4642_v19  ;;  %v4729_v18 = vld [vmem:[#allocation21 + $0x204] ss:$16 sps:$4 sm:$0xff]   ;;  %v4732_v19 = vld [vmem:[#allocation21 + $0x20c] ss:$16 sps:$4 sm:$0xff]  }
 0x42e   :  { %3425 = vmatpush1.bf16.msra.mxu0 %v4637_v20  ;;  %3507 = vmatpush1.bf16.msra.mxu1 %v4640_v21  ;;  %v5508_v20 = vld [vmem:[#allocation20] sm:$0xf] }
 0x42f   :  { %3426 = vmatprep.subr.bf16.mxu0 %v4645_v63  ;;  %3508 = vmatprep.subr.bf16.mxu1 %v4648_v22  ;;  %v1795_v21 = vrot.slane %v5508_v20, %v5471_v0  ;;  %v1799_v63 = vrot.slane %v5508_v20, %v5476_v2  ;;  %v1807_v22 = vrot.slane %v5508_v20, %v5479_v3 }
 0x432   :  { %3427 = vmatpush1.bf16.msra.mxu0 %v4643_v23  ;;  %3509 = vmatpush1.bf16.msra.mxu1 %v4646_v24 }
 0x433   :  { %3428 = vmatprep.subr.bf16.mxu0 %v4651_v25  ;;  %3510 = vmatprep.subr.bf16.mxu1 %v4654_v26 }
 0x436   :  { %3429 = vmatpush1.bf16.msra.mxu0 %v4649_v1  ;;  %3511 = vmatpush1.bf16.msra.mxu1 %v4652_v27 }
 0x437   :  { %3430 = vmatprep.subr.bf16.mxu0 %v4657_v28  ;;  %3512 = vmatprep.subr.bf16.mxu1 %v4660_v29 }
 0x43a   :  { %3431 = vmatpush1.bf16.msra.mxu0 %v4655_v30  ;;  %3513 = vmatpush1.bf16.msra.mxu1 %v4658_v8 }
 0x43b   :  { %3432 = vmatprep.subr.bf16.mxu0 %v4663_v31  ;;  %3514 = vmatprep.subr.bf16.mxu1 %v4666_v32 }
 0x43e   :  { %3433 = vmatpush1.bf16.msra.mxu0 %v4661_v33  ;;  %3515 = vmatpush1.bf16.msra.mxu1 %v4664_v34 }
 0x43f   :  { %3434 = vmatprep.subr.bf16.mxu0 %v4669_v35  ;;  %3516 = vmatprep.subr.bf16.mxu1 %v4672_v36 }
 0x442   :  { %3435 = vmatpush1.bf16.msra.mxu0 %v4667_v37  ;;  %3517 = vmatpush1.bf16.msra.mxu1 %v4670_v38 }
 0x443   :  { %3436 = vmatprep.subr.bf16.mxu0 %v4675_v39  ;;  %3518 = vmatprep.subr.bf16.mxu1 %v4678_v41  ;;  %v4727_v39 = vld [vmem:[#allocation21 + $0x200] ss:$16 sps:$4 sm:$0xff]   ;;  %v4730_v41 = vld [vmem:[#allocation21 + $0x208] ss:$16 sps:$4 sm:$0xff]  }
 0x446   :  { %3437 = vmatpush1.bf16.msra.mxu0 %v4673_v42  ;;  %3519 = vmatpush1.bf16.msra.mxu1 %v4676_v43  ;;  %v4735_v43 = vld [vmem:[#allocation21 + $0x224] ss:$16 sps:$4 sm:$0xff]  }
 0x447   :  { %3438 = vmatprep.subr.bf16.mxu0 %v4681_v44  ;;  %3520 = vmatprep.subr.bf16.mxu1 %v4684_v46  ;;  %v4738_v44 = vld [vmem:[#allocation21 + $0x22c] ss:$16 sps:$4 sm:$0xff]  }
 0x44a   :  { %3439 = vmatpush1.bf16.msra.mxu0 %v4679_v47  ;;  %3521 = vmatpush1.bf16.msra.mxu1 %v4682_v48  ;;  %v4733_v47 = vld [vmem:[#allocation21 + $0x220] ss:$16 sps:$4 sm:$0xff]   ;;  %v4736_v48 = vld [vmem:[#allocation21 + $0x228] ss:$16 sps:$4 sm:$0xff]  }
 0x44b   :  { %3440 = vmatprep.subr.bf16.mxu0 %v4687_v49  ;;  %3522 = vmatprep.subr.bf16.mxu1 %v4690_v50  ;;  %v4741_v49 = vld [vmem:[#allocation21 + $0x244] ss:$16 sps:$4 sm:$0xff]   ;;  %v4744_v50 = vld [vmem:[#allocation21 + $0x24c] ss:$16 sps:$4 sm:$0xff]  }
 0x44e   :  { %3441 = vmatpush1.bf16.msra.mxu0 %v4685_v51  ;;  %3523 = vmatpush1.bf16.msra.mxu1 %v4688_v52  ;;  %v4739_v51 = vld [vmem:[#allocation21 + $0x240] ss:$16 sps:$4 sm:$0xff]   ;;  %v4742_v52 = vld [vmem:[#allocation21 + $0x248] ss:$16 sps:$4 sm:$0xff]  }
 0x44f   :  { %3442 = vmatprep.subr.bf16.mxu0 %v4693_v53  ;;  %3524 = vmatprep.subr.bf16.mxu1 %v4696_v54  ;;  %v4747_v53 = vld [vmem:[#allocation21 + $0x264] ss:$16 sps:$4 sm:$0xff]   ;;  %v4750_v54 = vld [vmem:[#allocation21 + $0x26c] ss:$16 sps:$4 sm:$0xff]  }
 0x452   :  { %3443 = vmatpush1.bf16.msra.mxu0 %v4691_v55  ;;  %3525 = vmatpush1.bf16.msra.mxu1 %v4694_v56  ;;  %v4745_v55 = vld [vmem:[#allocation21 + $0x260] ss:$16 sps:$4 sm:$0xff]   ;;  %v4748_v56 = vld [vmem:[#allocation21 + $0x268] ss:$16 sps:$4 sm:$0xff]  }
 0x453   :  { %3444 = vmatprep.subr.bf16.mxu0 %v4699_v57  ;;  %3526 = vmatprep.subr.bf16.mxu1 %v4702_v58  ;;  %v4753_v57 = vld [vmem:[#allocation21 + $0x284] ss:$16 sps:$4 sm:$0xff]   ;;  %v4756_v58 = vld [vmem:[#allocation21 + $0x28c] ss:$16 sps:$4 sm:$0xff]  }
 0x456   :  { %3445 = vmatpush1.bf16.msra.mxu0 %v4697_v59  ;;  %3527 = vmatpush1.bf16.msra.mxu1 %v4700_v60  ;;  %v4751_v59 = vld [vmem:[#allocation21 + $0x280] ss:$16 sps:$4 sm:$0xff]   ;;  %v4754_v60 = vld [vmem:[#allocation21 + $0x288] ss:$16 sps:$4 sm:$0xff]  }
 0x457   :  { %3446 = vmatprep.subr.bf16.mxu0 %v4705_v61  ;;  %3528 = vmatprep.subr.bf16.mxu1 %v4708_v62  ;;  %v4759_v61 = vld [vmem:[#allocation21 + $0x2a4] ss:$16 sps:$4 sm:$0xff]   ;;  %v4762_v62 = vld [vmem:[#allocation21 + $0x2ac] ss:$16 sps:$4 sm:$0xff]  }
 0x45a   :  { %3447 = vmatpush1.bf16.msra.mxu0 %v4703_v4  ;;  %3529 = vmatpush1.bf16.msra.mxu1 %v4706_v40  ;;  %v4757_v4 = vld [vmem:[#allocation21 + $0x2a0] ss:$16 sps:$4 sm:$0xff]   ;;  %v4760_v40 = vld [vmem:[#allocation21 + $0x2a8] ss:$16 sps:$4 sm:$0xff]  }
 0x45b   :  { %3448 = vmatprep.subr.bf16.mxu0 %v4711_v5  ;;  %3530 = vmatprep.subr.bf16.mxu1 %v4714_v6  ;;  %v4765_v5 = vld [vmem:[#allocation21 + $0x2c4] ss:$16 sps:$4 sm:$0xff]   ;;  %v4768_v6 = vld [vmem:[#allocation21 + $0x2cc] ss:$16 sps:$4 sm:$0xff]  }
 0x45e   :  { %3449 = vmatpush1.bf16.msra.mxu0 %v4709_v7  ;;  %3531 = vmatpush1.bf16.msra.mxu1 %v4712_v9  ;;  %v4763_v7 = vld [vmem:[#allocation21 + $0x2c0] ss:$16 sps:$4 sm:$0xff]   ;;  %v4766_v9 = vld [vmem:[#allocation21 + $0x2c8] ss:$16 sps:$4 sm:$0xff]  }
 0x45f   :  { %3450 = vmatprep.subr.bf16.mxu0 %v4717_v45  ;;  %3532 = vmatprep.subr.bf16.mxu1 %v4720_v10  ;;  %v4771_v45 = vld [vmem:[#allocation21 + $0x2e4] ss:$16 sps:$4 sm:$0xff]   ;;  %v4774_v10 = vld [vmem:[#allocation21 + $0x2ec] ss:$16 sps:$4 sm:$0xff]  }
 0x462   :  { %3451 = vmatpush1.bf16.msra.mxu0 %v4715_v11  ;;  %3533 = vmatpush1.bf16.msra.mxu1 %v4718_v12  ;;  %v4769_v11 = vld [vmem:[#allocation21 + $0x2e0] ss:$16 sps:$4 sm:$0xff]   ;;  %v4772_v12 = vld [vmem:[#allocation21 + $0x2e8] ss:$16 sps:$4 sm:$0xff]  }
 0x463   :  { %3452 = vmatprep.subr.bf16.mxu0 %v4723_v14  ;;  %3534 = vmatprep.subr.bf16.mxu1 %v4726_v15  ;;  %v4777_v14 = vld [vmem:[#allocation21 + $0x304] ss:$16 sps:$4 sm:$0xff]   ;;  %v4780_v15 = vld [vmem:[#allocation21 + $0x30c] ss:$16 sps:$4 sm:$0xff]  }
 0x466   :  { %3453 = vmatpush1.bf16.msra.mxu0 %v4721_v16  ;;  %3535 = vmatpush1.bf16.msra.mxu1 %v4724_v17  ;;  %v4775_v16 = vld [vmem:[#allocation21 + $0x300] ss:$16 sps:$4 sm:$0xff]   ;;  %v4778_v17 = vld [vmem:[#allocation21 + $0x308] ss:$16 sps:$4 sm:$0xff]  }
 0x467   :  { %3463 = vmatprep.subr.bf16.mxu0 %v4729_v18  ;;  %3545 = vmatprep.subr.bf16.mxu1 %v4732_v19  ;;  %v4783_v18 = vld [vmem:[#allocation21 + $0x324] ss:$16 sps:$4 sm:$0xff]   ;;  %v4786_v19 = vld [vmem:[#allocation21 + $0x32c] ss:$16 sps:$4 sm:$0xff]  }
 0x4fc   :  { %v2527_v23 = vpop.f32.mrb[12].mxu0  ;;  %v5516_v24 = vpop.f32.mrb[12].mxu1 }
 0x4fd   :  { %v4144_v25 = vadd.f32 %v2527_v23, %v1795_v21  ;;  %v2529_v26 = vpop.f32.mrb[13].mxu0  ;;  %v2611_v1 = vpop.f32.mrb[13].mxu1  ;;  %v4781_v21 = vld [vmem:[#allocation21 + $0x320] ss:$16 sps:$4 sm:$0xff]   ;;  %v4792_v23 = vld [vmem:[#allocation21 + $0x34c] ss:$16 sps:$4 sm:$0xff]  }
 0x4fe   :  { %v4145_v27 = vadd.f32 %v2529_v26, %v1799_v63  ;;  %v4147_v28 = vadd.f32 %v2611_v1, %v1807_v22  ;;  %v2531_v29 = vpop.f32.mrb[14].mxu0  ;;  %v2613_v30 = vpop.f32.mrb[14].mxu1  ;;  %v4784_v63 = vld [vmem:[#allocation21 + $0x328] ss:$16 sps:$4 sm:$0xff]   ;;  %v4789_v22 = vld [vmem:[#allocation21 + $0x344] ss:$16 sps:$4 sm:$0xff]  }
 0x4ff   :  { %vm2616_vm1 = vcmp.gt.f32.partialorder %v4144_v25, 0.0  ;;  %v2532_v8 = vpop.f32.mrb[15].mxu0  ;;  %v2614_v31 = vpop.f32.mrb[15].mxu1  ;;  %v4790_v26 = vld [vmem:[#allocation21 + $0x348] ss:$16 sps:$4 sm:$0xff]  }
 0x500   :  { %v2620_v32 = vsel %vm2616_vm1, %v4144_v25, 0.0  ;;  %vm2617_vm3 = vcmp.gt.f32.partialorder %v4145_v27, 0.0  ;;  %vm2619_vm4 = vcmp.gt.f32.partialorder %v4147_v28, 0.0  ;;  %v4787_v25 = vld [vmem:[#allocation21 + $0x340] ss:$16 sps:$4 sm:$0xff]   ;;  %v1803_v31 = vrot.slane %v5508_v20, %v5490_v13 }
 0x501   :  { %v2624_v33 = vmin.f32 %v2620_v32, 3.4028235e+38  ;;  %v2621_v34 = vsel %vm2617_vm3, %v4145_v27, 0.0  ;;  %v2623_v35 = vsel %vm2619_vm4, %v4147_v28, 0.0  ;;  %v4795_v1 = vld [vmem:[#allocation21 + $0x364] ss:$16 sps:$4 sm:$0xff]  }
 0x502   :  { %v2625_v36 = vmin.f32 %v2621_v34, 3.4028235e+38  ;;  %v2627_v37 = vmin.f32 %v2623_v35, 3.4028235e+38  ;;  %v4798_v27 = vld [vmem:[#allocation21 + $0x36c] ss:$16 sps:$4 sm:$0xff]  }
 0x503   :  { %v2628_v42 = vpack.c.bf16 %v2624_v33, %v2624_v33  ;;  %v4793_v28 = vld [vmem:[#allocation21 + $0x360] ss:$16 sps:$4 sm:$0xff]   ;;  %v4796_v29 = vld [vmem:[#allocation21 + $0x368] ss:$16 sps:$4 sm:$0xff]   ;;  %v4801_v30 = vld [vmem:[#allocation21 + $0x384] ss:$16 sps:$4 sm:$0xff]  }
 0x504   :  { %v2629_v38 = vpack.c.bf16 %v2625_v36, %v2625_v36  ;;  %v2631_v46 = vpack.c.bf16 %v2627_v37, %v2627_v37  ;;  %v4804_v8 = vld [vmem:[#allocation21 + $0x38c] ss:$16 sps:$4 sm:$0xff]   ;;  %v4799_v32 = vld [vmem:[#allocation21 + $0x380] ss:$16 sps:$4 sm:$0xff]   ;;  %v4802_v33 = vld [vmem:[#allocation21 + $0x388] ss:$16 sps:$4 sm:$0xff]   ;;  %v4146_v36 = vadd.f32 %v5516_v24, %v1803_v31 }
 0x505   :  { %v4807_v34 = vld [vmem:[#allocation21 + $0x3a4] ss:$16 sps:$4 sm:$0xff]   ;;  %v4810_v35 = vld [vmem:[#allocation21 + $0x3ac] ss:$16 sps:$4 sm:$0xff]   ;;  %v4805_v37 = vld [vmem:[#allocation21 + $0x3a0] ss:$16 sps:$4 sm:$0xff]  }
 0x506   :  { %3454 = vmatprep.mubr.bf16.mxu0 %v2629_v38  ;;  %3536 = vmatprep.mubr.bf16.mxu1 %v2629_v38  ;;  %v4808_v38 = vld [vmem:[#allocation21 + $0x3a8] ss:$16 sps:$4 sm:$0xff]   ;;  %vm2618_vm5 = vcmp.gt.f32.partialorder %v4146_v36, 0.0  ;;  %v4811_v20 = vld [vmem:[#allocation21 + $0x3c0] ss:$16 sps:$4 sm:$0xff]  }
 0x507   :  { %3455 = vmatmul.mubr.bf16.vlgmr.msra.gmra.mrb[16].mxu0 %v2628_v42  ;;  %3537 = vmatmul.mubr.bf16.vlgmr.msra.gmra.mrb[16].mxu1 %v2628_v42  ;;  %v4814_v42 = vld [vmem:[#allocation21 + $0x3c8] ss:$16 sps:$4 sm:$0xff]   ;;  %v4817_v24 = vld [vmem:[#allocation21 + $0x3e0] ss:$16 sps:$4 sm:$0xff]  }
 0x508   :  { %3464 = vmatpush1.bf16.msra.mxu0 %v4727_v39  ;;  %3546 = vmatpush1.bf16.msra.mxu1 %v4730_v41  ;;  %v4813_v39 = vld [vmem:[#allocation21 + $0x3c4] ss:$16 sps:$4 sm:$0xff]   ;;  %v4816_v41 = vld [vmem:[#allocation21 + $0x3cc] ss:$16 sps:$4 sm:$0xff]  }
 0x509   :  { %3495 = vmatprep.mubr.bf16.mxu0 %v2631_v46  ;;  %3577 = vmatprep.mubr.bf16.mxu1 %v2631_v46  ;;  %v2622_v46 = vsel %vm2618_vm5, %v4146_v36, 0.0 }
 0x50a   :  { %3465 = vmatprep.subr.bf16.mxu0 %v4735_v43  ;;  %3547 = vmatprep.subr.bf16.mxu1 %v4738_v44  ;;  %v4819_v43 = vld [vmem:[#allocation21 + $0x3e4] ss:$16 sps:$4 sm:$0xff]   ;;  %v4822_v44 = vld [vmem:[#allocation21 + $0x3ec] ss:$16 sps:$4 sm:$0xff]  }
 0x50c   :  { %3466 = vmatpush1.bf16.msra.mxu0 %v4733_v47  ;;  %3548 = vmatpush1.bf16.msra.mxu1 %v4736_v48  ;;  %v4820_v47 = vld [vmem:[#allocation21 + $0x3e8] ss:$16 sps:$4 sm:$0xff]   ;;  %v2626_v48 = vmin.f32 %v2622_v46, 3.4028235e+38 }
 0x50d   :  { %3467 = vmatprep.subr.bf16.mxu0 %v4741_v49  ;;  %3549 = vmatprep.subr.bf16.mxu1 %v4744_v50  ;;  %v2760_v50 = vld [vmem:[#allocation23] sm:$0xf] }
 0x50e   :  { %v2630_v49 = vpack.c.bf16 %v2626_v48, %v2626_v48 }
 0x510   :  { %3468 = vmatpush1.bf16.msra.mxu0 %v4739_v51  ;;  %3550 = vmatpush1.bf16.msra.mxu1 %v4742_v52  ;;  %v2765_v51 = vrot.slane %v2760_v50, %v5471_v0  ;;  %v2773_v52 = vrot.slane %v2760_v50, %v5490_v13 }
 0x511   :  { %3469 = vmatprep.subr.bf16.mxu0 %v4747_v53  ;;  %3551 = vmatprep.subr.bf16.mxu1 %v4750_v54  ;;  %v2769_v53 = vrot.slane %v2760_v50, %v5476_v2  ;;  %v2777_v54 = vrot.slane %v2760_v50, %v5479_v3 }
 0x514   :  { %3470 = vmatpush1.bf16.msra.mxu0 %v4745_v55  ;;  %3552 = vmatpush1.bf16.msra.mxu1 %v4748_v56 }
 0x515   :  { %3471 = vmatprep.subr.bf16.mxu0 %v4753_v57  ;;  %3553 = vmatprep.subr.bf16.mxu1 %v4756_v58 }
 0x518   :  { %3472 = vmatpush1.bf16.msra.mxu0 %v4751_v59  ;;  %3554 = vmatpush1.bf16.msra.mxu1 %v4754_v60 }
 0x519   :  { %3473 = vmatprep.subr.bf16.mxu0 %v4759_v61  ;;  %3555 = vmatprep.subr.bf16.mxu1 %v4762_v62 }
 0x51c   :  { %3474 = vmatpush1.bf16.msra.mxu0 %v4757_v4  ;;  %3556 = vmatpush1.bf16.msra.mxu1 %v4760_v40 }
 0x51d   :  { %3475 = vmatprep.subr.bf16.mxu0 %v4765_v5  ;;  %3557 = vmatprep.subr.bf16.mxu1 %v4768_v6 }
 0x520   :  { %3476 = vmatpush1.bf16.msra.mxu0 %v4763_v7  ;;  %3558 = vmatpush1.bf16.msra.mxu1 %v4766_v9  ;;  %v3602_v9 = vld [vmem:[#allocation24] sm:$0xf] }
 0x521   :  { %3477 = vmatprep.subr.bf16.mxu0 %v4771_v45  ;;  %3559 = vmatprep.subr.bf16.mxu1 %v4774_v10 }
 0x524   :  { %3478 = vmatpush1.bf16.msra.mxu0 %v4769_v11  ;;  %3560 = vmatpush1.bf16.msra.mxu1 %v4772_v12 }
 0x525   :  { %3479 = vmatprep.subr.bf16.mxu0 %v4777_v14  ;;  %3561 = vmatprep.subr.bf16.mxu1 %v4780_v15 }
 0x528   :  { %3480 = vmatpush1.bf16.msra.mxu0 %v4775_v16  ;;  %3562 = vmatpush1.bf16.msra.mxu1 %v4778_v17 }
 0x529   :  { %3481 = vmatprep.subr.bf16.mxu0 %v4783_v18  ;;  %3563 = vmatprep.subr.bf16.mxu1 %v4786_v19  ;;  %v3611_v18 = vrot.slane %v3602_v9, %v5471_v0 }
 0x52c   :  { %3482 = vmatpush1.bf16.msra.mxu0 %v4781_v21  ;;  %3564 = vmatpush1.bf16.msra.mxu1 %v4784_v63  ;;  %v3619_v21 = vrot.slane %v3602_v9, %v5490_v13 }
 0x52d   :  { %3483 = vmatprep.subr.bf16.mxu0 %v4789_v22  ;;  %3565 = vmatprep.subr.bf16.mxu1 %v4792_v23  ;;  %v3615_v22 = vrot.slane %v3602_v9, %v5476_v2 }
 0x530   :  { %3484 = vmatpush1.bf16.msra.mxu0 %v4787_v25  ;;  %3566 = vmatpush1.bf16.msra.mxu1 %v4790_v26 }
 0x531   :  { %3485 = vmatprep.subr.bf16.mxu0 %v4795_v1  ;;  %3567 = vmatprep.subr.bf16.mxu1 %v4798_v27 }
 0x534   :  { %3486 = vmatpush1.bf16.msra.mxu0 %v4793_v28  ;;  %3568 = vmatpush1.bf16.msra.mxu1 %v4796_v29  ;;  %v3623_v28 = vrot.slane %v3602_v9, %v5479_v3  ;;  %v3642_v3 = vstv %s5562_s14  ;;  %s5135_s14 = scalar_lea.vmem %s3664_s8, 32 }
 0x535   :  { %3487 = vmatprep.subr.bf16.mxu0 %v4801_v30  ;;  %3569 = vmatprep.subr.bf16.mxu1 %v4804_v8  ;;  %p5136_p0 = scmp.ne.s32.totalorder %s3664_s8, %s5135_s14  ;;  %p5141_p2 = scmp.lt.s32.totalorder %s5135_s14, %s5135_s14 }
 0x537   :  { %p5142_p3 = por %p5141_p2, %p5140_p1 }
 0x538   :  { %3488 = vmatpush1.bf16.msra.mxu0 %v4799_v32  ;;  %3570 = vmatpush1.bf16.msra.mxu1 %v4802_v33 }
 0x539   :  { %3489 = vmatprep.subr.bf16.mxu0 %v4807_v34  ;;  %3571 = vmatprep.subr.bf16.mxu1 %v4810_v35  ;;  %p5143_p4 = pnand %p5142_p3, %p5136_p0 }
 0x53c   :  { %3490 = vmatpush1.bf16.msra.mxu0 %v4805_v37  ;;  %3572 = vmatpush1.bf16.msra.mxu1 %v4808_v38 }
 0x53d   :  { %3491 = vmatprep.subr.bf16.mxu0 %v4813_v39  ;;  %3573 = vmatprep.subr.bf16.mxu1 %v4816_v41 }
 0x540   :  { %3492 = vmatpush1.bf16.msra.mxu0 %v4811_v20  ;;  %3574 = vmatpush1.bf16.msra.mxu1 %v4814_v42 }
 0x541   :  { %3493 = vmatprep.subr.bf16.mxu0 %v4819_v43  ;;  %3575 = vmatprep.subr.bf16.mxu1 %v4822_v44 }
 0x544   :  { %3494 = vmatpush1.bf16.msra.mxu0 %v4817_v24  ;;  %3576 = vmatpush1.bf16.msra.mxu1 %v4820_v47 }
 0x547   :  { %3496 = vmatmul.mubr.bf16.vlgmr.msra.gmra.mrb[16].mxu0 %v2630_v49  ;;  %3578 = vmatmul.mubr.bf16.vlgmr.msra.gmra.mrb[16].mxu1 %v2630_v49 }
 0x61a   :  { %v3497_v55 = vpop.f32.mrb[16].mxu0  ;;  %v3579_v56 = vpop.f32.mrb[16].mxu1 }
 0x61b   :  { %v4148_v57 = vadd.f32 %v3497_v55, %v2765_v51  ;;  %v4150_v58 = vadd.f32 %v3579_v56, %v2773_v52  ;;  %v3499_v59 = vpop.f32.mrb[17].mxu0  ;;  %v3581_v60 = vpop.f32.mrb[17].mxu1 }
 0x61c   :  { %v4149_v61 = vadd.f32 %v3499_v59, %v2769_v53  ;;  %v4151_v62 = vadd.f32 %v3581_v60, %v2777_v54  ;;  %v3501_v4 = vpop.f32.mrb[18].mxu0  ;;  %v3583_v40 = vpop.f32.mrb[18].mxu1 }
 0x61d   :  { %vm3586_vm6 = vcmp.gt.f32.partialorder %v4148_v57, 0.0  ;;  %vm3588_vm7 = vcmp.gt.f32.partialorder %v4150_v58, 0.0  ;;  %v3502_v5 = vpop.f32.mrb[19].mxu0  ;;  %v3584_v6 = vpop.f32.mrb[19].mxu1 }
 0x61e   :  { %v3590_v7 = vsel %vm3586_vm6, %v4148_v57, 0.0  ;;  %v3592_v45 = vsel %vm3588_vm7, %v4150_v58, 0.0  ;;  %vm3587_vm8 = vcmp.gt.f32.partialorder %v4149_v61, 0.0  ;;  %vm3589_vm9 = vcmp.gt.f32.partialorder %v4151_v62, 0.0 }
 0x61f   :  { %v3594_v10 = vmin.f32 %v3590_v7, 3.4028235e+38  ;;  %v3596_v11 = vmin.f32 %v3592_v45, 3.4028235e+38  ;;  %v3591_v12 = vsel %vm3587_vm8, %v4149_v61, 0.0  ;;  %v3593_v14 = vsel %vm3589_vm9, %v4151_v62, 0.0 }
 0x620   :  { %v3595_v15 = vmin.f32 %v3591_v12, 3.4028235e+38  ;;  %v3597_v16 = vmin.f32 %v3593_v14, 3.4028235e+38 }
 0x621   :  { %v3598_v17 = vpack.c.bf16 %v3594_v10, %v3594_v10  ;;  %v3600_v19 = vpack.c.bf16 %v3596_v11, %v3596_v11 }
 0x622   :  { %v3599_v63 = vpack.c.bf16 %v3595_v15, %v3595_v15  ;;  %v3601_v23 = vpack.c.bf16 %v3597_v16, %v3597_v16 }
 0x623   :  { %v3603_v25 = vunpack.c.l.bf16 %v3598_v17  ;;  %v3605_v26 = vunpack.c.l.bf16 %v3600_v19 }
 0x624   :  { %v3604_v1 = vunpack.c.l.bf16 %v3599_v63  ;;  %v3606_v27 = vunpack.c.l.bf16 %v3601_v23 }
 0x625   :  { %v3628_v29 = vmul.f32 %v3611_v18, %v3603_v25  ;;  %v3630_v30 = vmul.f32 %v3619_v21, %v3605_v26 }
 0x626   :  { %v3629_v8 = vmul.f32 %v3615_v22, %v3604_v1  ;;  %v3631_v32 = vmul.f32 %v3623_v28, %v3606_v27 }
 0x627   :  { %v3632_v31 = vsel %vm581_vm2, %v3628_v29, 0.0  ;;  %v3635_v13 = vsel %vm581_vm2, %v3630_v30, 0.0 }
 0x628   :  { %v3633_v0 = vsel %vm581_vm2, %v3629_v8, 0.0  ;;  %v3637_v2 = vsel %vm581_vm2, %v3631_v32, 0.0  ;;  %vm3655_vm2 = vcmask 1024  }
 0x629   :  { %v3634_v33 = vadd.f32 %v3633_v0, %v3632_v31 }
 0x62b   :  { %v3636_v34 = vadd.f32 %v3635_v13, %v3634_v33 }
 0x62d   :  { %v3638_v35 = vadd.f32 %v3637_v2, %v3636_v34 }
 0x62f   :  { %3639 = vadd.xlane.f32.xlu0 %v3638_v35 }
 0x6bc   :  { %v3640_v36 = vpop.xlane.xlu0 %3639 }
 0x6bd   :  { %v3643_v37 = vadd.f32 %v3642_v3, %v3640_v36 }
 0x6bf   :  { %vm3644_vm10 = vcmp.ne.f32.partialorder %v3643_v37, %v3643_v37 }
 0x6c0   :  { %v3645_v38 = vsel %vm3644_vm10, 0.0, %v3643_v37 }
 0x6c1   :  { %vm3646_vm11 = vcmp.eq.f32.partialorder %v3645_v38, inf }
 0x6c2   :  { %v3647_v39 = vsel %vm3646_vm11, 3.4028235e+38, %v3645_v38 }
 0x6c3   :  { %vm3648_vm12 = vcmp.eq.f32.partialorder %v3647_v39, -inf }
 0x6c4   :  { %v3649_v41 = vsel %vm3648_vm12, -3.4028235e+38, %v3647_v39 }
 0x6c5   :  { %v3650_v20 = vsub.f32 0.0, %v3649_v41 }
 0x6c7   :  { %v3651_v42 = vmul.f32 1.442695, %v3650_v20 }
 0x6c9   :  { %4823 = vpow2.f32 %v3651_v42 }
 0x6d3   :  { %v4824_v43 = vpop.eup %4823 }
 0x6d4   :  { %v3653_v44 = vadd.f32 1.0, %v4824_v43 }
 0x6d6   :  { %4825 = vrcp.f32 %v3653_v44 }
 0x6e0   :  { %v4826_v46 = vpop.eup %4825 }
 0x6e1   :  { %3656 = vst.msk [vmem:[#allocation26] sm:$0x3] %vm3655_vm2, %v4826_v46 }
 0x6e2   :  { %5146 = shalt.err (!%p5143_p4)
}
 0x6e3   :  { %s5147_s20 = scalar_lea.hbm %s5563_s15, 32 }
 0x6e4   :  { %p5148_p5 = scmp.ne.s32.totalorder %s5563_s15, %s5147_s20  ;;  %p5151_p6 = scmp.lt.u32.totalorder %s5147_s20, %s5563_s15 }
 0x6e6   :  { %p5153_p7 = pnand %p5151_p6, %p5148_p5 }
 0x6e8   :  { %5156 = shalt.err (!%p5153_p7)
}
 0x6e9   :  { %3666 = dma.vmem_to_hbm [thread:$0]  %s3664_s8, 32, %s5563_s15, [#allocation5]  }
 0x6ea   :  { %5173 = dma.done.wait [#allocation5], 32  }
 0x6eb   :  { %5174 = vsyncadd [#allocation5], 4294967264 }
 0x6ec   :  { %3670 = vsyncpa [#allocation4], 1 }
 0x6ed   :  { %3671 = vsyncpa [#allocation7], 1 }
 0x6ee   :  { %3672 = vsyncpa [#allocation10], 1 }
 0x6ef   :  { %3673 = vsyncpa [#allocation13], 1 }
 0x6f0   :  { %3674 = vsyncpa [#allocation16], 1 }
 0x6f1   :  { %3675 = vsyncpa [#allocation19], 1 }
 0x6f2   :  { %3676 = vsyncpa [#allocation22], 1 }
 0x6f3   :  { %3677 = vsyncpa [#allocation25], 1 }
 0x6f4   :  { %3678 = vsyncpa [#allocation5], 1 }

</bundles_post_ra>
